<compile_context>
chip_gen: v5e
topology: v5e:2x2
jax: 0.10.0
libtpu: 0.0.40
codegen_flags: <defaults>
</compile_context>

<pallas_src>
import functools

import jax
import jax.numpy as jnp
import numpy as np
from jax.experimental import pallas as pl
from jax.experimental.pallas import tpu as pltpu

BN_EPS = 1e-5
GUARD = 128  # lane guard band on each side of the flat spatial axis (>= Wp+1, 128-aligned)


def _fused_conv_bn_relu_stack_kernel(*refs, full_dim, N, H, W, eps):
    """Whole conv->BN->ReLU stack, everything resident in VMEM.

    refs layout (L = len(full_dim)-1 layers):
      refs[0]            : x      (C0, 2*G + P)   guard-banded, zero-padded, channel-major flat
      refs[1]            : mask   (1, P)          1.0 at valid (interior) flat positions
      refs[2 : 2+3L]     : per layer (w (9, cout, cin), gamma (cout,1), beta (cout,1))
      refs[2+3L]         : output (C_last, P)
      refs[3+3L : ]      : ping-pong activation buffers (C_max, 2*G + P)
    """
    L = len(full_dim) - 1
    Hp, Wp = H + 2, W + 2
    P = N * Hp * Wp
    G = GUARD
    inv_cnt = 1.0 / float(N * H * W)

    x_ref, mask_ref = refs[0], refs[1]
    param_refs = refs[2:2 + 3 * L]
    o_ref = refs[2 + 3 * L]
    bufs = refs[3 + 3 * L:]

    mask = mask_ref[...]                      # (1, P), loaded once, reused by every layer

    # Zero the ping-pong buffers ONCE: guard bands + spatial halo stay zero forever after,
    # because every later write is the masked [G, G+P) window only.  (~16 vregs each.)
    for b in bufs:
        b[...] = jnp.zeros_like(b)

    src = None                                # layer 0 reads the guarded input ref directly
    for l in range(L):                        # unrolled at trace time
        cin, cout = full_dim[l], full_dim[l + 1]
        w_ref = param_refs[3 * l]             # (9, cout, cin)  taps-major weights
        g_ref = param_refs[3 * l + 1]         # (cout, 1)       BN gamma
        b_ref = param_refs[3 * l + 2]         # (cout, 1)       BN beta

        # 3x3 conv = 9 shifted-window reads contracted on the MXU into a lane-dense
        # (cout, P) accumulator.  Tap shift = constant lane offset into the guard-banded
        # flat buffer; the per-batch halo rows/cols are zero, so edges are handled exactly.
        acc = None
        for dy in range(3):
            for dx in range(3):
                s = (dy - 1) * Wp + (dx - 1)
                if src is None:
                    xwin = x_ref[:, G + s:G + s + P]        # (cin, P)
                else:
                    xwin = src[0:cin, G + s:G + s + P]      # (cin, P)
                w_t = w_ref[dy * 3 + dx]                    # (cout, cin)
                part = jnp.dot(w_t, xwin, preferred_element_type=jnp.float32)
                acc = part if acc is None else acc + part

        # Training-mode BatchNorm over the valid positions only (halo masked out of the
        # statistics), fused with ReLU.  Lane reductions -> XLU, rsqrt -> EUP.  Conv bias
        # omitted: exactly cancelled by the batch-mean subtraction.  Two-pass variance on
        # the reused centered tensor d (avoids E[x^2]-mean^2 cancellation).
        mean = jnp.sum(acc * mask, axis=1, keepdims=True) * inv_cnt      # (cout, 1)
        d = (acc - mean) * mask                                          # halo -> 0
        var = jnp.sum(d * d, axis=1, keepdims=True) * inv_cnt            # biased variance
        scale = g_ref[...] * jax.lax.rsqrt(var + eps)
        y = jnp.maximum(d * scale + b_ref[...], 0.0) * mask              # halo forced to 0

        if l + 1 < L:
            dst = bufs[l % len(bufs)]
            dst[0:cout, G:G + P] = y          # lane-aligned start (G=128), dense store
            src = dst
        else:
            o_ref[...] = y.astype(o_ref.dtype)   # lane-dense (C_last, P) output slab
    # TODO(synk): BN running_mean/running_var momentum updates (training side effect) not emitted.
    # TODO(synk): for non-toy N/H/W add a 'parallel' grid (v7x megacore) with a two-phase
    #             batch-stats pass, and bf16 MXU operands on v6e/v7x.


@jax.jit
def conv2ds_sequential_forward(x_nchw, params):
    """x_nchw: (N, C0, H, W) like PyTorch.  params: list of (w_HWIO, b, gamma, beta)."""
    N, C0, H, W = x_nchw.shape
    Hp, Wp = H + 2, W + 2
    P = N * Hp * Wp
    G = GUARD
    Ptot = 2 * G + P
    full_dim = (C0,) + tuple(w.shape[-1] for (w, _, _, _) in params)
    L = len(params)
    C_last, C_max = full_dim[-1], max(full_dim)

    # Input repack: NCHW -> zero-padded, channel-major, flat spatial with guard bands.
    # The spatial-halo zeros double as the conv zero padding; the guard bands absorb the
    # +-(Wp+1) tap shifts so in-kernel window reads never go out of bounds.
    xp = jnp.pad(x_nchw, ((0, 0), (0, 0), (1, 1), (1, 1)))              # (N, C0, Hp, Wp)
    x_flat = jnp.transpose(xp, (1, 0, 2, 3)).reshape(C0, P)             # (C0, P)
    x_in = jnp.pad(x_flat, ((0, 0), (G, G)))                            # (C0, Ptot)

    # Static validity mask over the flat spatial axis (1 inside, 0 on the halo).
    yy, xx = np.arange(Hp), np.arange(Wp)
    valid = ((yy >= 1) & (yy <= H))[:, None] & ((xx >= 1) & (xx <= W))[None, :]
    mask = jnp.asarray(np.broadcast_to(valid, (N, Hp, Wp)).reshape(1, P).astype(np.float32))

    # Parameters: taps-major (9, cout, cin) weights; (cout, 1) gamma/beta.
    # Conv bias not passed: cancelled exactly by training-mode BN (reference keeps it).
    flat = []
    for (w, _b, g, be) in params:
        cin, cout = w.shape[2], w.shape[3]
        flat += [jnp.transpose(w, (0, 1, 3, 2)).reshape(9, cout, cin),
                 g.reshape(cout, 1), be.reshape(cout, 1)]

    flops = sum(2 * N * H * W * 9 * ci * co for ci, co in zip(full_dim[:-1], full_dim[1:]))
    bytes_accessed = int(4 * (x_in.size + mask.size + C_last * P + sum(a.size for a in flat)))

    vmem = pl.BlockSpec(memory_space=pltpu.MemorySpace.VMEM)
    kernel = functools.partial(_fused_conv_bn_relu_stack_kernel,
                               full_dim=full_dim, N=N, H=H, W=W, eps=BN_EPS)
    n_bufs = min(2, max(L - 1, 0))            # ping-pong: at most 2 max-sized buffers

    out_flat = pl.pallas_call(
        kernel,
        out_shape=jax.ShapeDtypeStruct((C_last, P), x_nchw.dtype),
        in_specs=[vmem] * (2 + 3 * L),
        out_specs=vmem,
        scratch_shapes=[pltpu.VMEM((C_max, Ptot), jnp.float32) for _ in range(n_bufs)],
        compiler_params=pltpu.CompilerParams(vmem_limit_bytes=32 * 1024 * 1024),
        cost_estimate=pl.CostEstimate(flops=flops,
                                      transcendentals=int(sum(full_dim[1:])),
                                      bytes_accessed=bytes_accessed),
    )(x_in, mask, *flat)

    # Back to NCHW (drop the spatial halo) — tiny, lane-dense slab, fused by XLA.
    out = out_flat.reshape(C_last, N, Hp, Wp)[:, :, 1:H + 1, 1:W + 1]
    return jnp.transpose(out, (1, 0, 2, 3))


def init_params(key, full_dim):
    """Deterministic synthetic parameters for each (conv, bn) layer."""
    params = []
    for cin, cout in zip(full_dim[:-1], full_dim[1:]):
        key, kw, kb, kg, kbe = jax.random.split(key, 5)
        w = 0.1 * jax.random.normal(kw, (3, 3, cin, cout), jnp.float32)   # HWIO
        b = 0.1 * jax.random.normal(kb, (cout,), jnp.float32)
        gamma = 1.0 + 0.1 * jax.random.normal(kg, (cout,), jnp.float32)
        beta = 0.1 * jax.random.normal(kbe, (cout,), jnp.float32)
        params.append((w, b, gamma, beta))
    return params


def _reference_forward(x_nchw, params, eps=BN_EPS):
    """Pure-JAX reference (same math, XLA conv, *with* conv bias) for validation."""
    out = jnp.transpose(x_nchw, (0, 2, 3, 1))
    for (w, b, gamma, beta) in params:
        y = jax.lax.conv_general_dilated(
            out, w, window_strides=(1, 1), padding="SAME",
            dimension_numbers=("NHWC", "HWIO", "NHWC")) + b
        mean = y.mean(axis=(0, 1, 2))
        var = ((y - mean) ** 2).mean(axis=(0, 1, 2))
        y = (y - mean) / jnp.sqrt(var + eps) * gamma + beta
        out = jnp.maximum(y, 0.0)
    return jnp.transpose(out, (0, 3, 1, 2))


if __name__ == "__main__":
    key = jax.random.PRNGKey(0)
    full_dim = (4, 8, 16)          # conv stack: 4 -> 8 -> 16 channels
    N, H, W = 2, 16, 16

    key, kx, kp = jax.random.split(key, 3)
    x = jax.random.normal(kx, (N, full_dim[0], H, W), jnp.float32)   # NCHW like PyTorch
    params = init_params(kp, full_dim)

    out = conv2ds_sequential_forward(x, params)
    out = jax.block_until_ready(out)

    ref = _reference_forward(x, params)
    assert out.shape == (N, full_dim[-1], H, W), out.shape
    np.testing.assert_allclose(np.asarray(out), np.asarray(ref), rtol=1e-4, atol=1e-4)

    print("KERNEL_OK")
</pallas_src>

<mosaic_0001>
module attributes {stable_mosaic.version = 11 : i64} {
  func.func @_fused_conv_bn_relu_stack_kernel(%arg0: memref<4x904xf32, #tpu.memory_space<vmem>>, %arg1: memref<1x648xf32, #tpu.memory_space<vmem>>, %arg2: memref<9x8x4xf32, #tpu.memory_space<vmem>>, %arg3: memref<8x1xf32, #tpu.memory_space<vmem>>, %arg4: memref<8x1xf32, #tpu.memory_space<vmem>>, %arg5: memref<9x16x8xf32, #tpu.memory_space<vmem>>, %arg6: memref<16x1xf32, #tpu.memory_space<vmem>>, %arg7: memref<16x1xf32, #tpu.memory_space<vmem>>, %arg8: memref<16x648xf32, #tpu.memory_space<vmem>>, %arg9: memref<16x904xf32, #tpu.memory_space<vmem>>) attributes {dimension_semantics = [], scalar_prefetch = 0 : i64, scratch_operands = 1 : i64, tpu.core_type = #tpu.core_type<tc>} {
    %c0 = arith.constant 0 : index
    %c0_0 = arith.constant 0 : index
    %0 = vector.load %arg1[%c0, %c0_0] : memref<1x648xf32, #tpu.memory_space<vmem>>, vector<1x648xf32>
    %cst = arith.constant 0.000000e+00 : f32
    %1 = vector.broadcast %cst : f32 to vector<16x904xf32>
    %c0_1 = arith.constant 0 : index
    %c0_2 = arith.constant 0 : index
    %2 = vector.load %arg9[%c0_1, %c0_2] : memref<16x904xf32, #tpu.memory_space<vmem>>, vector<16x904xf32>
    tpu.vector_store %arg9[%c0_1, %c0_2], %1 {strides = array<i32>} : memref<16x904xf32, #tpu.memory_space<vmem>>, vector<16x904xf32>,
    %c0_3 = arith.constant 0 : index
    %c109 = arith.constant 109 : index
    %3 = vector.load %arg0[%c0_3, %c109] : memref<4x904xf32, #tpu.memory_space<vmem>>, vector<4x648xf32>
    %c0_4 = arith.constant 0 : index
    %c0_5 = arith.constant 0 : index
    %c0_6 = arith.constant 0 : index
    %4 = vector.load %arg2[%c0_4, %c0_5, %c0_6] : memref<9x8x4xf32, #tpu.memory_space<vmem>>, vector<1x8x4xf32>
    %5 = vector.shape_cast %4 : vector<1x8x4xf32> to vector<8x4xf32>
    %cst_7 = arith.constant dense<0.000000e+00> : vector<8x648xf32>
    %6 = tpu.matmul %5, %3, %cst_7 {dimension_numbers = #tpu.dot_dimension_numbers<[1], [0], [0], [1], [0, 0, 1, 1], [], []>} : vector<8x4xf32>, vector<4x648xf32>, vector<8x648xf32> -> vector<8x648xf32>
    %c0_8 = arith.constant 0 : index
    %c110 = arith.constant 110 : index
    %7 = vector.load %arg0[%c0_8, %c110] : memref<4x904xf32, #tpu.memory_space<vmem>>, vector<4x648xf32>
    %c1 = arith.constant 1 : index
    %c0_9 = arith.constant 0 : index
    %c0_10 = arith.constant 0 : index
    %8 = vector.load %arg2[%c1, %c0_9, %c0_10] : memref<9x8x4xf32, #tpu.memory_space<vmem>>, vector<1x8x4xf32>
    %9 = vector.shape_cast %8 : vector<1x8x4xf32> to vector<8x4xf32>
    %cst_11 = arith.constant dense<0.000000e+00> : vector<8x648xf32>
    %10 = tpu.matmul %9, %7, %cst_11 {dimension_numbers = #tpu.dot_dimension_numbers<[1], [0], [0], [1], [0, 0, 1, 1], [], []>} : vector<8x4xf32>, vector<4x648xf32>, vector<8x648xf32> -> vector<8x648xf32>
    %11 = arith.addf %6, %10 : vector<8x648xf32>
    %c0_12 = arith.constant 0 : index
    %c111 = arith.constant 111 : index
    %12 = vector.load %arg0[%c0_12, %c111] : memref<4x904xf32, #tpu.memory_space<vmem>>, vector<4x648xf32>
    %c2 = arith.constant 2 : index
    %c0_13 = arith.constant 0 : index
    %c0_14 = arith.constant 0 : index
    %13 = vector.load %arg2[%c2, %c0_13, %c0_14] : memref<9x8x4xf32, #tpu.memory_space<vmem>>, vector<1x8x4xf32>
    %14 = vector.shape_cast %13 : vector<1x8x4xf32> to vector<8x4xf32>
    %cst_15 = arith.constant dense<0.000000e+00> : vector<8x648xf32>
    %15 = tpu.matmul %14, %12, %cst_15 {dimension_numbers = #tpu.dot_dimension_numbers<[1], [0], [0], [1], [0, 0, 1, 1], [], []>} : vector<8x4xf32>, vector<4x648xf32>, vector<8x648xf32> -> vector<8x648xf32>
    %16 = arith.addf %11, %15 : vector<8x648xf32>
    %c0_16 = arith.constant 0 : index
    %c127 = arith.constant 127 : index
    %17 = vector.load %arg0[%c0_16, %c127] : memref<4x904xf32, #tpu.memory_space<vmem>>, vector<4x648xf32>
    %c3 = arith.constant 3 : index
    %c0_17 = arith.constant 0 : index
    %c0_18 = arith.constant 0 : index
    %18 = vector.load %arg2[%c3, %c0_17, %c0_18] : memref<9x8x4xf32, #tpu.memory_space<vmem>>, vector<1x8x4xf32>
    %19 = vector.shape_cast %18 : vector<1x8x4xf32> to vector<8x4xf32>
    %cst_19 = arith.constant dense<0.000000e+00> : vector<8x648xf32>
    %20 = tpu.matmul %19, %17, %cst_19 {dimension_numbers = #tpu.dot_dimension_numbers<[1], [0], [0], [1], [0, 0, 1, 1], [], []>} : vector<8x4xf32>, vector<4x648xf32>, vector<8x648xf32> -> vector<8x648xf32>
    %21 = arith.addf %16, %20 : vector<8x648xf32>
    %c0_20 = arith.constant 0 : index
    %c128 = arith.constant 128 : index
    %22 = vector.load %arg0[%c0_20, %c128] : memref<4x904xf32, #tpu.memory_space<vmem>>, vector<4x648xf32>
    %c4 = arith.constant 4 : index
    %c0_21 = arith.constant 0 : index
    %c0_22 = arith.constant 0 : index
    %23 = vector.load %arg2[%c4, %c0_21, %c0_22] : memref<9x8x4xf32, #tpu.memory_space<vmem>>, vector<1x8x4xf32>
    %24 = vector.shape_cast %23 : vector<1x8x4xf32> to vector<8x4xf32>
    %cst_23 = arith.constant dense<0.000000e+00> : vector<8x648xf32>
    %25 = tpu.matmul %24, %22, %cst_23 {dimension_numbers = #tpu.dot_dimension_numbers<[1], [0], [0], [1], [0, 0, 1, 1], [], []>} : vector<8x4xf32>, vector<4x648xf32>, vector<8x648xf32> -> vector<8x648xf32>
    %26 = arith.addf %21, %25 : vector<8x648xf32>
    %c0_24 = arith.constant 0 : index
    %c129 = arith.constant 129 : index
    %27 = vector.load %arg0[%c0_24, %c129] : memref<4x904xf32, #tpu.memory_space<vmem>>, vector<4x648xf32>
    %c5 = arith.constant 5 : index
    %c0_25 = arith.constant 0 : index
    %c0_26 = arith.constant 0 : index
    %28 = vector.load %arg2[%c5, %c0_25, %c0_26] : memref<9x8x4xf32, #tpu.memory_space<vmem>>, vector<1x8x4xf32>
    %29 = vector.shape_cast %28 : vector<1x8x4xf32> to vector<8x4xf32>
    %cst_27 = arith.constant dense<0.000000e+00> : vector<8x648xf32>
    %30 = tpu.matmul %29, %27, %cst_27 {dimension_numbers = #tpu.dot_dimension_numbers<[1], [0], [0], [1], [0, 0, 1, 1], [], []>} : vector<8x4xf32>, vector<4x648xf32>, vector<8x648xf32> -> vector<8x648xf32>
    %31 = arith.addf %26, %30 : vector<8x648xf32>
    %c0_28 = arith.constant 0 : index
    %c145 = arith.constant 145 : index
    %32 = vector.load %arg0[%c0_28, %c145] : memref<4x904xf32, #tpu.memory_space<vmem>>, vector<4x648xf32>
    %c6 = arith.constant 6 : index
    %c0_29 = arith.constant 0 : index
    %c0_30 = arith.constant 0 : index
    %33 = vector.load %arg2[%c6, %c0_29, %c0_30] : memref<9x8x4xf32, #tpu.memory_space<vmem>>, vector<1x8x4xf32>
    %34 = vector.shape_cast %33 : vector<1x8x4xf32> to vector<8x4xf32>
    %cst_31 = arith.constant dense<0.000000e+00> : vector<8x648xf32>
    %35 = tpu.matmul %34, %32, %cst_31 {dimension_numbers = #tpu.dot_dimension_numbers<[1], [0], [0], [1], [0, 0, 1, 1], [], []>} : vector<8x4xf32>, vector<4x648xf32>, vector<8x648xf32> -> vector<8x648xf32>
    %36 = arith.addf %31, %35 : vector<8x648xf32>
    %c0_32 = arith.constant 0 : index
    %c146 = arith.constant 146 : index
    %37 = vector.load %arg0[%c0_32, %c146] : memref<4x904xf32, #tpu.memory_space<vmem>>, vector<4x648xf32>
    %c7 = arith.constant 7 : index
    %c0_33 = arith.constant 0 : index
    %c0_34 = arith.constant 0 : index
    %38 = vector.load %arg2[%c7, %c0_33, %c0_34] : memref<9x8x4xf32, #tpu.memory_space<vmem>>, vector<1x8x4xf32>
    %39 = vector.shape_cast %38 : vector<1x8x4xf32> to vector<8x4xf32>
    %cst_35 = arith.constant dense<0.000000e+00> : vector<8x648xf32>
    %40 = tpu.matmul %39, %37, %cst_35 {dimension_numbers = #tpu.dot_dimension_numbers<[1], [0], [0], [1], [0, 0, 1, 1], [], []>} : vector<8x4xf32>, vector<4x648xf32>, vector<8x648xf32> -> vector<8x648xf32>
    %41 = arith.addf %36, %40 : vector<8x648xf32>
    %c0_36 = arith.constant 0 : index
    %c147 = arith.constant 147 : index
    %42 = vector.load %arg0[%c0_36, %c147] : memref<4x904xf32, #tpu.memory_space<vmem>>, vector<4x648xf32>
    %c8 = arith.constant 8 : index
    %c0_37 = arith.constant 0 : index
    %c0_38 = arith.constant 0 : index
    %43 = vector.load %arg2[%c8, %c0_37, %c0_38] : memref<9x8x4xf32, #tpu.memory_space<vmem>>, vector<1x8x4xf32>
    %44 = vector.shape_cast %43 : vector<1x8x4xf32> to vector<8x4xf32>
    %cst_39 = arith.constant dense<0.000000e+00> : vector<8x648xf32>
    %45 = tpu.matmul %44, %42, %cst_39 {dimension_numbers = #tpu.dot_dimension_numbers<[1], [0], [0], [1], [0, 0, 1, 1], [], []>} : vector<8x4xf32>, vector<4x648xf32>, vector<8x648xf32> -> vector<8x648xf32>
    %46 = arith.addf %41, %45 : vector<8x648xf32>
    %47 = vector.broadcast %0 : vector<1x648xf32> to vector<8x648xf32>
    %48 = arith.mulf %46, %47 : vector<8x648xf32>
    %cst_40 = arith.constant dense<0.000000e+00> : vector<8xf32>
    %49 = vector.multi_reduction <add>, %48, %cst_40 [1] : vector<8x648xf32> to vector<8xf32>
    %50 = vector.shape_cast %49 : vector<8xf32> to vector<8x1xf32>
    %cst_41 = arith.constant 0.001953125 : f32
    %51 = vector.broadcast %cst_41 : f32 to vector<8x1xf32>
    %52 = arith.mulf %50, %51 : vector<8x1xf32>
    %53 = vector.broadcast %52 : vector<8x1xf32> to vector<8x648xf32>
    %54 = arith.subf %46, %53 : vector<8x648xf32>
    %55 = vector.broadcast %0 : vector<1x648xf32> to vector<8x648xf32>
    %56 = arith.mulf %54, %55 : vector<8x648xf32>
    %57 = arith.mulf %56, %56 : vector<8x648xf32>
    %cst_42 = arith.constant dense<0.000000e+00> : vector<8xf32>
    %58 = vector.multi_reduction <add>, %57, %cst_42 [1] : vector<8x648xf32> to vector<8xf32>
    %59 = vector.shape_cast %58 : vector<8xf32> to vector<8x1xf32>
    %cst_43 = arith.constant 0.001953125 : f32
    %60 = vector.broadcast %cst_43 : f32 to vector<8x1xf32>
    %61 = arith.mulf %59, %60 : vector<8x1xf32>
    %c0_44 = arith.constant 0 : index
    %c0_45 = arith.constant 0 : index
    %62 = vector.load %arg3[%c0_44, %c0_45] : memref<8x1xf32, #tpu.memory_space<vmem>>, vector<8x1xf32>
    %cst_46 = arith.constant 9.99999974E-6 : f32
    %63 = vector.broadcast %cst_46 : f32 to vector<8x1xf32>
    %64 = arith.addf %61, %63 : vector<8x1xf32>
    %65 = math.rsqrt %64 : vector<8x1xf32>
    %66 = arith.mulf %62, %65 : vector<8x1xf32>
    %67 = vector.broadcast %66 : vector<8x1xf32> to vector<8x648xf32>
    %68 = arith.mulf %56, %67 : vector<8x648xf32>
    %c0_47 = arith.constant 0 : index
    %c0_48 = arith.constant 0 : index
    %69 = vector.load %arg4[%c0_47, %c0_48] : memref<8x1xf32, #tpu.memory_space<vmem>>, vector<8x1xf32>
    %70 = vector.broadcast %69 : vector<8x1xf32> to vector<8x648xf32>
    %71 = arith.addf %68, %70 : vector<8x648xf32>
    %cst_49 = arith.constant 0.000000e+00 : f32
    %72 = vector.broadcast %cst_49 : f32 to vector<8x648xf32>
    %73 = arith.maximumf %71, %72 : vector<8x648xf32>
    %74 = vector.broadcast %0 : vector<1x648xf32> to vector<8x648xf32>
    %75 = arith.mulf %73, %74 : vector<8x648xf32>
    %c0_50 = arith.constant 0 : index
    %c128_51 = arith.constant 128 : index
    %76 = vector.load %arg9[%c0_50, %c128_51] : memref<16x904xf32, #tpu.memory_space<vmem>>, vector<8x648xf32>
    tpu.vector_store %arg9[%c0_50, %c128_51], %75 {strides = array<i32>} : memref<16x904xf32, #tpu.memory_space<vmem>>, vector<8x648xf32>,
    %c0_52 = arith.constant 0 : index
    %c109_53 = arith.constant 109 : index
    %77 = vector.load %arg9[%c0_52, %c109_53] : memref<16x904xf32, #tpu.memory_space<vmem>>, vector<8x648xf32>
    %c0_54 = arith.constant 0 : index
    %c0_55 = arith.constant 0 : index
    %c0_56 = arith.constant 0 : index
    %78 = vector.load %arg5[%c0_54, %c0_55, %c0_56] : memref<9x16x8xf32, #tpu.memory_space<vmem>>, vector<1x16x8xf32>
    %79 = vector.shape_cast %78 : vector<1x16x8xf32> to vector<16x8xf32>
    %cst_57 = arith.constant dense<0.000000e+00> : vector<16x648xf32>
    %80 = tpu.matmul %79, %77, %cst_57 {dimension_numbers = #tpu.dot_dimension_numbers<[1], [0], [0], [1], [0, 0, 1, 1], [], []>} : vector<16x8xf32>, vector<8x648xf32>, vector<16x648xf32> -> vector<16x648xf32>
    %c0_58 = arith.constant 0 : index
    %c110_59 = arith.constant 110 : index
    %81 = vector.load %arg9[%c0_58, %c110_59] : memref<16x904xf32, #tpu.memory_space<vmem>>, vector<8x648xf32>
    %c1_60 = arith.constant 1 : index
    %c0_61 = arith.constant 0 : index
    %c0_62 = arith.constant 0 : index
    %82 = vector.load %arg5[%c1_60, %c0_61, %c0_62] : memref<9x16x8xf32, #tpu.memory_space<vmem>>, vector<1x16x8xf32>
    %83 = vector.shape_cast %82 : vector<1x16x8xf32> to vector<16x8xf32>
    %cst_63 = arith.constant dense<0.000000e+00> : vector<16x648xf32>
    %84 = tpu.matmul %83, %81, %cst_63 {dimension_numbers = #tpu.dot_dimension_numbers<[1], [0], [0], [1], [0, 0, 1, 1], [], []>} : vector<16x8xf32>, vector<8x648xf32>, vector<16x648xf32> -> vector<16x648xf32>
    %85 = arith.addf %80, %84 : vector<16x648xf32>
    %c0_64 = arith.constant 0 : index
    %c111_65 = arith.constant 111 : index
    %86 = vector.load %arg9[%c0_64, %c111_65] : memref<16x904xf32, #tpu.memory_space<vmem>>, vector<8x648xf32>
    %c2_66 = arith.constant 2 : index
    %c0_67 = arith.constant 0 : index
    %c0_68 = arith.constant 0 : index
    %87 = vector.load %arg5[%c2_66, %c0_67, %c0_68] : memref<9x16x8xf32, #tpu.memory_space<vmem>>, vector<1x16x8xf32>
    %88 = vector.shape_cast %87 : vector<1x16x8xf32> to vector<16x8xf32>
    %cst_69 = arith.constant dense<0.000000e+00> : vector<16x648xf32>
    %89 = tpu.matmul %88, %86, %cst_69 {dimension_numbers = #tpu.dot_dimension_numbers<[1], [0], [0], [1], [0, 0, 1, 1], [], []>} : vector<16x8xf32>, vector<8x648xf32>, vector<16x648xf32> -> vector<16x648xf32>
    %90 = arith.addf %85, %89 : vector<16x648xf32>
    %c0_70 = arith.constant 0 : index
    %c127_71 = arith.constant 127 : index
    %91 = vector.load %arg9[%c0_70, %c127_71] : memref<16x904xf32, #tpu.memory_space<vmem>>, vector<8x648xf32>
    %c3_72 = arith.constant 3 : index
    %c0_73 = arith.constant 0 : index
    %c0_74 = arith.constant 0 : index
    %92 = vector.load %arg5[%c3_72, %c0_73, %c0_74] : memref<9x16x8xf32, #tpu.memory_space<vmem>>, vector<1x16x8xf32>
    %93 = vector.shape_cast %92 : vector<1x16x8xf32> to vector<16x8xf32>
    %cst_75 = arith.constant dense<0.000000e+00> : vector<16x648xf32>
    %94 = tpu.matmul %93, %91, %cst_75 {dimension_numbers = #tpu.dot_dimension_numbers<[1], [0], [0], [1], [0, 0, 1, 1], [], []>} : vector<16x8xf32>, vector<8x648xf32>, vector<16x648xf32> -> vector<16x648xf32>
    %95 = arith.addf %90, %94 : vector<16x648xf32>
    %c0_76 = arith.constant 0 : index
    %c128_77 = arith.constant 128 : index
    %96 = vector.load %arg9[%c0_76, %c128_77] : memref<16x904xf32, #tpu.memory_space<vmem>>, vector<8x648xf32>
    %c4_78 = arith.constant 4 : index
    %c0_79 = arith.constant 0 : index
    %c0_80 = arith.constant 0 : index
    %97 = vector.load %arg5[%c4_78, %c0_79, %c0_80] : memref<9x16x8xf32, #tpu.memory_space<vmem>>, vector<1x16x8xf32>
    %98 = vector.shape_cast %97 : vector<1x16x8xf32> to vector<16x8xf32>
    %cst_81 = arith.constant dense<0.000000e+00> : vector<16x648xf32>
    %99 = tpu.matmul %98, %96, %cst_81 {dimension_numbers = #tpu.dot_dimension_numbers<[1], [0], [0], [1], [0, 0, 1, 1], [], []>} : vector<16x8xf32>, vector<8x648xf32>, vector<16x648xf32> -> vector<16x648xf32>
    %100 = arith.addf %95, %99 : vector<16x648xf32>
    %c0_82 = arith.constant 0 : index
    %c129_83 = arith.constant 129 : index
    %101 = vector.load %arg9[%c0_82, %c129_83] : memref<16x904xf32, #tpu.memory_space<vmem>>, vector<8x648xf32>
    %c5_84 = arith.constant 5 : index
    %c0_85 = arith.constant 0 : index
    %c0_86 = arith.constant 0 : index
    %102 = vector.load %arg5[%c5_84, %c0_85, %c0_86] : memref<9x16x8xf32, #tpu.memory_space<vmem>>, vector<1x16x8xf32>
    %103 = vector.shape_cast %102 : vector<1x16x8xf32> to vector<16x8xf32>
    %cst_87 = arith.constant dense<0.000000e+00> : vector<16x648xf32>
    %104 = tpu.matmul %103, %101, %cst_87 {dimension_numbers = #tpu.dot_dimension_numbers<[1], [0], [0], [1], [0, 0, 1, 1], [], []>} : vector<16x8xf32>, vector<8x648xf32>, vector<16x648xf32> -> vector<16x648xf32>
    %105 = arith.addf %100, %104 : vector<16x648xf32>
    %c0_88 = arith.constant 0 : index
    %c145_89 = arith.constant 145 : index
    %106 = vector.load %arg9[%c0_88, %c145_89] : memref<16x904xf32, #tpu.memory_space<vmem>>, vector<8x648xf32>
    %c6_90 = arith.constant 6 : index
    %c0_91 = arith.constant 0 : index
    %c0_92 = arith.constant 0 : index
    %107 = vector.load %arg5[%c6_90, %c0_91, %c0_92] : memref<9x16x8xf32, #tpu.memory_space<vmem>>, vector<1x16x8xf32>
    %108 = vector.shape_cast %107 : vector<1x16x8xf32> to vector<16x8xf32>
    %cst_93 = arith.constant dense<0.000000e+00> : vector<16x648xf32>
    %109 = tpu.matmul %108, %106, %cst_93 {dimension_numbers = #tpu.dot_dimension_numbers<[1], [0], [0], [1], [0, 0, 1, 1], [], []>} : vector<16x8xf32>, vector<8x648xf32>, vector<16x648xf32> -> vector<16x648xf32>
    %110 = arith.addf %105, %109 : vector<16x648xf32>
    %c0_94 = arith.constant 0 : index
    %c146_95 = arith.constant 146 : index
    %111 = vector.load %arg9[%c0_94, %c146_95] : memref<16x904xf32, #tpu.memory_space<vmem>>, vector<8x648xf32>
    %c7_96 = arith.constant 7 : index
    %c0_97 = arith.constant 0 : index
    %c0_98 = arith.constant 0 : index
    %112 = vector.load %arg5[%c7_96, %c0_97, %c0_98] : memref<9x16x8xf32, #tpu.memory_space<vmem>>, vector<1x16x8xf32>
    %113 = vector.shape_cast %112 : vector<1x16x8xf32> to vector<16x8xf32>
    %cst_99 = arith.constant dense<0.000000e+00> : vector<16x648xf32>
    %114 = tpu.matmul %113, %111, %cst_99 {dimension_numbers = #tpu.dot_dimension_numbers<[1], [0], [0], [1], [0, 0, 1, 1], [], []>} : vector<16x8xf32>, vector<8x648xf32>, vector<16x648xf32> -> vector<16x648xf32>
    %115 = arith.addf %110, %114 : vector<16x648xf32>
    %c0_100 = arith.constant 0 : index
    %c147_101 = arith.constant 147 : index
    %116 = vector.load %arg9[%c0_100, %c147_101] : memref<16x904xf32, #tpu.memory_space<vmem>>, vector<8x648xf32>
    %c8_102 = arith.constant 8 : index
    %c0_103 = arith.constant 0 : index
    %c0_104 = arith.constant 0 : index
    %117 = vector.load %arg5[%c8_102, %c0_103, %c0_104] : memref<9x16x8xf32, #tpu.memory_space<vmem>>, vector<1x16x8xf32>
    %118 = vector.shape_cast %117 : vector<1x16x8xf32> to vector<16x8xf32>
    %cst_105 = arith.constant dense<0.000000e+00> : vector<16x648xf32>
    %119 = tpu.matmul %118, %116, %cst_105 {dimension_numbers = #tpu.dot_dimension_numbers<[1], [0], [0], [1], [0, 0, 1, 1], [], []>} : vector<16x8xf32>, vector<8x648xf32>, vector<16x648xf32> -> vector<16x648xf32>
    %120 = arith.addf %115, %119 : vector<16x648xf32>
    %121 = vector.broadcast %0 : vector<1x648xf32> to vector<16x648xf32>
    %122 = arith.mulf %120, %121 : vector<16x648xf32>
    %cst_106 = arith.constant dense<0.000000e+00> : vector<16xf32>
    %123 = vector.multi_reduction <add>, %122, %cst_106 [1] : vector<16x648xf32> to vector<16xf32>
    %124 = vector.shape_cast %123 : vector<16xf32> to vector<16x1xf32>
    %cst_107 = arith.constant 0.001953125 : f32
    %125 = vector.broadcast %cst_107 : f32 to vector<16x1xf32>
    %126 = arith.mulf %124, %125 : vector<16x1xf32>
    %127 = vector.broadcast %126 : vector<16x1xf32> to vector<16x648xf32>
    %128 = arith.subf %120, %127 : vector<16x648xf32>
    %129 = vector.broadcast %0 : vector<1x648xf32> to vector<16x648xf32>
    %130 = arith.mulf %128, %129 : vector<16x648xf32>
    %131 = arith.mulf %130, %130 : vector<16x648xf32>
    %cst_108 = arith.constant dense<0.000000e+00> : vector<16xf32>
    %132 = vector.multi_reduction <add>, %131, %cst_108 [1] : vector<16x648xf32> to vector<16xf32>
    %133 = vector.shape_cast %132 : vector<16xf32> to vector<16x1xf32>
    %cst_109 = arith.constant 0.001953125 : f32
    %134 = vector.broadcast %cst_109 : f32 to vector<16x1xf32>
    %135 = arith.mulf %133, %134 : vector<16x1xf32>
    %c0_110 = arith.constant 0 : index
    %c0_111 = arith.constant 0 : index
    %136 = vector.load %arg6[%c0_110, %c0_111] : memref<16x1xf32, #tpu.memory_space<vmem>>, vector<16x1xf32>
    %cst_112 = arith.constant 9.99999974E-6 : f32
    %137 = vector.broadcast %cst_112 : f32 to vector<16x1xf32>
    %138 = arith.addf %135, %137 : vector<16x1xf32>
    %139 = math.rsqrt %138 : vector<16x1xf32>
    %140 = arith.mulf %136, %139 : vector<16x1xf32>
    %141 = vector.broadcast %140 : vector<16x1xf32> to vector<16x648xf32>
    %142 = arith.mulf %130, %141 : vector<16x648xf32>
    %c0_113 = arith.constant 0 : index
    %c0_114 = arith.constant 0 : index
    %143 = vector.load %arg7[%c0_113, %c0_114] : memref<16x1xf32, #tpu.memory_space<vmem>>, vector<16x1xf32>
    %144 = vector.broadcast %143 : vector<16x1xf32> to vector<16x648xf32>
    %145 = arith.addf %142, %144 : vector<16x648xf32>
    %cst_115 = arith.constant 0.000000e+00 : f32
    %146 = vector.broadcast %cst_115 : f32 to vector<16x648xf32>
    %147 = arith.maximumf %145, %146 : vector<16x648xf32>
    %148 = vector.broadcast %0 : vector<1x648xf32> to vector<16x648xf32>
    %149 = arith.mulf %147, %148 : vector<16x648xf32>
    %c0_116 = arith.constant 0 : index
    %c0_117 = arith.constant 0 : index
    %150 = vector.load %arg8[%c0_116, %c0_117] : memref<16x648xf32, #tpu.memory_space<vmem>>, vector<16x648xf32>
    tpu.vector_store %arg8[%c0_116, %c0_117], %149 {strides = array<i32>} : memref<16x648xf32, #tpu.memory_space<vmem>>, vector<16x648xf32>,
    return
  }
}

</mosaic_0001>

<bundles_post_ra>
// kernel: conv2ds_sequential_forward.1
= control target key start
LH: loop header
LB: loop body
LE: loop exit
PB: predicated region body
PF: predicated region fallthrough
CT: control target
= control target key end

     0   :  { %s3890_s11 = smov 18   ;;  %s3891_s12 = smov 19   ;;  %vm79_vm0 = vcmask 146432   ;;  %vm89_vm1 = vcmask 1043456   ;;  %vm85_vm2 = vcmask 31744   ;;  %vm245_vm3 = vcmask 154624   ;;  %s4750_s0 = inlined_call_operand.vmem [shape: f32[4,904], index: 0, kind: input, shape index: {}]   ;;  %s4751_s2 = inlined_call_operand.vmem [shape: f32[9,8,4], index: 2, kind: input, shape index: {}]   ;;  %s4752_s1 = inlined_call_operand.vmem [shape: f32[1,648], index: 1, kind: input, shape index: {}]   ;;  %s4753_s3 = inlined_call_operand.vmem [shape: f32[8,1], index: 3, kind: input, shape index: {}]   ;;  %s4754_s4 = inlined_call_operand.vmem [shape: f32[8,1], index: 4, kind: input, shape index: {}]   ;;  %s4755_s5 = inlined_call_operand.vmem [shape: f32[9,16,8], index: 5, kind: input, shape index: {}]   ;;  %s4756_s7 = inlined_call_operand.vmem [shape: f32[16,1], index: 7, kind: input, shape index: {}]   ;;  %s4757_s6 = inlined_call_operand.vmem [shape: f32[16,1], index: 6, kind: input, shape index: {}]   ;;  %s4758_s8 = inlined_call_operand.vmem [shape: f32[16,648], index: 8, kind: output, shape index: {}]  }
   0x1   :  { %v48_v0 = vld [vmem:[%s4750_s0 + $0x8] sm:$0xff]  ;;  %v47_v1 = vld [vmem:[%s4750_s0] sm:$0xff]  ;;  %v49_v2 = vld [vmem:[%s4750_s0 + $0x10] sm:$0xff]  ;;  %s3892_s21 = smov 17   ;;  %s3894_s22 = smov 127   ;;  %vm417_vm4 = vcmask 138240  }
   0x2   :  { %58 = vst [vmem:[#allocation1 + $0x10] ss:$2 sm:$0xff] %v48_v0  ;;  %v3967_v21 = vld [vmem:[%s4750_s0 + $0x14] sm:$0xff]  ;;  %v750_v23 = vld [vmem:[%s4750_s0 + $0x4] sm:$0xff]  ;;  %v751_v28 = vld [vmem:[%s4750_s0 + $0xc] sm:$0xff]  ;;  %s3895_s23 = smov 111  }
   0x3   :  { %56 = vst [vmem:[#allocation1] ss:$2 sm:$0xff] %v47_v1  ;;  %v567_v22 = vld [vmem:[%s4750_s0 + $0x18] sm:$0xf]  ;;  %s3893_s0 = smov 1   ;;  %s3896_s24 = smov 110  }
   0x4   :  { %60 = vst [vmem:[#allocation1 + $0x20] ss:$2 sm:$0xff] %v49_v2  ;;  %s3897_s25 = smov 109   ;;  %vm602_vm5 = vcmask 7168   ;;  %vm941_vm6 = vcmask 1039360   ;;  %vm1119_vm7 = vcmask 908288  }
   0x5   :  { %580 = vst [vmem:[#allocation1 + $0x30] ss:$2 sm:$0xff] %v567_v22  ;;  %vm1297_vm8 = vcmask 900096   ;;  %vm1475_vm9 = vcmask 891904   ;;  %vm37_vm10 = vcmask 64512  }
   0x9   :  { %v63_v3 = vld.sshfl [vmem:[#allocation1 + $0x10] sm:$0xff pattern:$0x75316420]  ;;  %v64_v4 = vld.sshfl [vmem:[#allocation1 + $0x18] sm:$0xff pattern:$0x75316420] }
   0xa   :  { %71 = vrot.lane.b32.xlu0 %v63_v3, %s3890_s11  ;;  %v61_v5 = vld.sshfl [vmem:[#allocation1] sm:$0xff pattern:$0x75316420]  ;;  %224 = vst [vmem:[#allocation1 + $0x10] ss:$2 sm:$0xff] %v48_v0 }
   0xb   :  { %67 = vrot.lane.b32.xlu1 %v61_v5, %s3890_s11  ;;  %v62_v6 = vld.sshfl [vmem:[#allocation1 + $0x8] sm:$0xff pattern:$0x75316420]  ;;  %v65_v7 = vld.sshfl [vmem:[#allocation1 + $0x20] sm:$0xff pattern:$0x75316420] }
   0xc   :  { %222 = vst [vmem:[#allocation1] ss:$2 sm:$0xff] %v47_v1  ;;  %75 = vrot.lane.b32.xlu2 %v65_v7, %s3890_s11  ;;  %v66_v8 = vld.sshfl [vmem:[#allocation1 + $0x28] sm:$0xff pattern:$0x75316420] }
   0xd   :  { %226 = vst [vmem:[#allocation1 + $0x20] ss:$2 sm:$0xff] %v49_v2  ;;  %v587_v47 = vld.sshfl [vmem:[#allocation1 + $0x30] sm:$0xff pattern:$0x75316420]  ;;  %v3546_v7 = vld [vmem:[%s4751_s2 + $0x8] sm:$0xff] }
  0x11   :  { %v229_v9 = vld.sshfl [vmem:[#allocation1 + $0x10] sm:$0xff pattern:$0x75316420]  ;;  %v230_v10 = vld.sshfl [vmem:[#allocation1 + $0x18] sm:$0xff pattern:$0x75316420] }
  0x12   :  { %73 = vrot.lane.b32.xlu0 %v64_v4, %s3890_s11  ;;  %396 = vst [vmem:[#allocation1 + $0x10] ss:$2 sm:$0xff] %v48_v0 }
  0x13   :  { %69 = vrot.lane.b32.xlu1 %v62_v6, %s3890_s11  ;;  %v227_v11 = vld.sshfl [vmem:[#allocation1] sm:$0xff pattern:$0x75316420]  ;;  %v228_v14 = vld.sshfl [vmem:[#allocation1 + $0x8] sm:$0xff pattern:$0x75316420] }
  0x14   :  { %v232_v12 = vld.sshfl [vmem:[#allocation1 + $0x28] sm:$0xff pattern:$0x75316420]  ;;  %v231_v13 = vld.sshfl [vmem:[#allocation1 + $0x20] sm:$0xff pattern:$0x75316420]  ;;  %233 = vrot.lane.b32.xlu2 %v227_v11, %s3891_s12 }
  0x15   :  { %398 = vst [vmem:[#allocation1 + $0x20] ss:$2 sm:$0xff] %v49_v2 }
  0x16   :  { %394 = vst [vmem:[#allocation1] ss:$2 sm:$0xff] %v47_v1 }
  0x19   :  { %v402_v15 = vld.sshfl [vmem:[#allocation1 + $0x18] sm:$0xff pattern:$0x75316420]  ;;  %v401_v16 = vld.sshfl [vmem:[#allocation1 + $0x10] sm:$0xff pattern:$0x75316420] }
  0x1a   :  { %235 = vrot.lane.b32.xlu0 %v228_v14, %s3891_s12  ;;  %576 = vst [vmem:[#allocation1 + $0x10] ss:$2 sm:$0xff] %v48_v0 }
  0x1b   :  { %77 = vrot.lane.b32.xlu1 %v66_v8, %s3890_s11 }
  0x1c   :  { %237 = vrot.lane.b32.xlu2 %v229_v9, %s3891_s12  ;;  %v403_v17 = vld.sshfl [vmem:[#allocation1 + $0x20] sm:$0xff pattern:$0x75316420]  ;;  %v404_v18 = vld.sshfl [vmem:[#allocation1 + $0x28] sm:$0xff pattern:$0x75316420] }
  0x1d   :  { %v400_v19 = vld.sshfl [vmem:[#allocation1 + $0x8] sm:$0xff pattern:$0x75316420]  ;;  %578 = vst [vmem:[#allocation1 + $0x20] ss:$2 sm:$0xff] %v49_v2 }
  0x1e   :  { %v399_v20 = vld.sshfl [vmem:[#allocation1] sm:$0xff pattern:$0x75316420] }
  0x1f   :  { %574 = vst [vmem:[#allocation1] ss:$2 sm:$0xff] %v47_v1 }
  0x21   :  { %v583_v24 = vld.sshfl [vmem:[#allocation1 + $0x10] sm:$0xff pattern:$0x75316420]  ;;  %v584_v27 = vld.sshfl [vmem:[#allocation1 + $0x18] sm:$0xff pattern:$0x75316420] }
  0x22   :  { %241 = vrot.lane.b32.xlu0 %v231_v13, %s3891_s12  ;;  %760 = vst [vmem:[#allocation1 + $0x10] ss:$2 sm:$0xff] %v751_v28 }
  0x23   :  { %243 = vrot.lane.b32.xlu1 %v232_v12, %s3891_s12 }
  0x24   :  { %239 = vrot.lane.b32.xlu2 %v230_v10, %s3891_s12  ;;  %v586_v25 = vld.sshfl [vmem:[#allocation1 + $0x28] sm:$0xff pattern:$0x75316420]  ;;  %v585_v26 = vld.sshfl [vmem:[#allocation1 + $0x20] sm:$0xff pattern:$0x75316420] }
  0x25   :  { %762 = vst [vmem:[#allocation1 + $0x20] ss:$2 sm:$0xff] %v3967_v21 }
  0x26   :  { %v582_v29 = vld.sshfl [vmem:[#allocation1 + $0x8] sm:$0xff pattern:$0x75316420]  ;;  %v581_v30 = vld.sshfl [vmem:[#allocation1] sm:$0xff pattern:$0x75316420] }
  0x27   :  { %758 = vst [vmem:[#allocation1] ss:$2 sm:$0xff] %v750_v23 }
  0x29   :  { %v3993_v35 = vld.sshfl [vmem:[#allocation1 + $0x10] sm:$0xff pattern:$0x75316420]  ;;  %v3995_v36 = vld.sshfl [vmem:[#allocation1 + $0x18] sm:$0xff pattern:$0x75316420] }
  0x2a   :  { %409 = vrot.lane.b32.xlu0 %v401_v16, %s3892_s21  ;;  %920 = vst [vmem:[#allocation1 + $0x10] ss:$2 sm:$0xff] %v751_v28 }
  0x2b   :  { %411 = vrot.lane.b32.xlu1 %v402_v15, %s3892_s21 }
  0x2c   :  { %405 = vrot.lane.b32.xlu2 %v399_v20, %s3892_s21  ;;  %v3984_v31 = vld.sshfl [vmem:[#allocation1 + $0x20] sm:$0xff pattern:$0x75316420]  ;;  %v3986_v32 = vld.sshfl [vmem:[#allocation1 + $0x28] sm:$0xff pattern:$0x75316420] }
  0x2d   :  { %922 = vst [vmem:[#allocation1 + $0x20] ss:$2 sm:$0xff] %v3967_v21 }
  0x2e   :  { %v3989_v33 = vld.sshfl [vmem:[#allocation1] sm:$0xff pattern:$0x75316420]  ;;  %v3991_v34 = vld.sshfl [vmem:[#allocation1 + $0x8] sm:$0xff pattern:$0x75316420] }
  0x2f   :  { %918 = vst [vmem:[#allocation1] ss:$2 sm:$0xff] %v750_v23 }
  0x31   :  { %v925_v37 = vld.sshfl [vmem:[#allocation1 + $0x10] sm:$0xff pattern:$0x75316420]  ;;  %v926_v38 = vld.sshfl [vmem:[#allocation1 + $0x18] sm:$0xff pattern:$0x75316420] }
  0x32   :  { %407 = vrot.lane.b32.xlu0 %v400_v19, %s3892_s21  ;;  %1098 = vst [vmem:[#allocation1 + $0x10] ss:$2 sm:$0xff] %v751_v28 }
  0x33   :  { %413 = vrot.lane.b32.xlu1 %v403_v17, %s3892_s21  ;;  %v50_v17 = vld [vmem:[%s4751_s2] sm:$0xff] }
  0x34   :  { %588 = vrot.lane.b32.xlu2 %v581_v30, %s3893_s0  ;;  %v927_v39 = vld.sshfl [vmem:[#allocation1 + $0x20] sm:$0xff pattern:$0x75316420]  ;;  %v928_v42 = vld.sshfl [vmem:[#allocation1 + $0x28] sm:$0xff pattern:$0x75316420] }
  0x35   :  { %1100 = vst [vmem:[#allocation1 + $0x20] ss:$2 sm:$0xff] %v3967_v21 }
  0x36   :  { %v923_v40 = vld.sshfl [vmem:[#allocation1] sm:$0xff pattern:$0x75316420]  ;;  %v924_v41 = vld.sshfl [vmem:[#allocation1 + $0x8] sm:$0xff pattern:$0x75316420] }
  0x37   :  { %1096 = vst [vmem:[#allocation1] ss:$2 sm:$0xff] %v750_v23 }
  0x39   :  { %v1103_v43 = vld.sshfl [vmem:[#allocation1 + $0x10] sm:$0xff pattern:$0x75316420]  ;;  %v1104_v46 = vld.sshfl [vmem:[#allocation1 + $0x18] sm:$0xff pattern:$0x75316420] }
  0x3a   :  { %590 = vrot.lane.b32.xlu0 %v582_v29, %s3893_s0  ;;  %1276 = vst [vmem:[#allocation1 + $0x10] ss:$2 sm:$0xff] %v751_v28 }
  0x3b   :  { %415 = vrot.lane.b32.xlu1 %v404_v18, %s3892_s21 }
  0x3c   :  { %592 = vrot.lane.b32.xlu2 %v583_v24, %s3893_s0  ;;  %v1105_v49 = vld.sshfl [vmem:[#allocation1 + $0x20] sm:$0xff pattern:$0x75316420]  ;;  %v1106_v50 = vld.sshfl [vmem:[#allocation1 + $0x28] sm:$0xff pattern:$0x75316420] }
  0x3d   :  { %1278 = vst [vmem:[#allocation1 + $0x20] ss:$2 sm:$0xff] %v3967_v21 }
  0x3e   :  { %v1102_v44 = vld.sshfl [vmem:[#allocation1 + $0x8] sm:$0xff pattern:$0x75316420]  ;;  %v1101_v45 = vld.sshfl [vmem:[#allocation1] sm:$0xff pattern:$0x75316420] }
  0x3f   :  { %1274 = vst [vmem:[#allocation1] ss:$2 sm:$0xff] %v750_v23 }
  0x41   :  { %v1281_v52 = vld.sshfl [vmem:[#allocation1 + $0x10] sm:$0xff pattern:$0x75316420]  ;;  %v1282_v53 = vld.sshfl [vmem:[#allocation1 + $0x18] sm:$0xff pattern:$0x75316420] }
  0x42   :  { %596 = vrot.lane.b32.xlu0 %v585_v26, %s3893_s0  ;;  %1454 = vst [vmem:[#allocation1 + $0x10] ss:$2 sm:$0xff] %v751_v28 }
  0x43   :  { %598 = vrot.lane.b32.xlu1 %v586_v25, %s3893_s0 }
  0x44   :  { %594 = vrot.lane.b32.xlu2 %v584_v27, %s3893_s0  ;;  %v1283_v54 = vld.sshfl [vmem:[#allocation1 + $0x20] sm:$0xff pattern:$0x75316420]  ;;  %v1284_v55 = vld.sshfl [vmem:[#allocation1 + $0x28] sm:$0xff pattern:$0x75316420] }
  0x45   :  { %1456 = vst [vmem:[#allocation1 + $0x20] ss:$2 sm:$0xff] %v3967_v21  ;;  %v3571_v27 = vld [vmem:[%s4751_s2 + $0x10] sm:$0xff] }
  0x46   :  { %v1280_v48 = vld.sshfl [vmem:[#allocation1 + $0x8] sm:$0xff pattern:$0x75316420]  ;;  %v1279_v51 = vld.sshfl [vmem:[#allocation1] sm:$0xff pattern:$0x75316420] }
  0x47   :  { %1452 = vst [vmem:[#allocation1] ss:$2 sm:$0xff] %v750_v23 }
  0x49   :  { %v1459_v59 = vld.sshfl [vmem:[#allocation1 + $0x10] sm:$0xff pattern:$0x75316420]  ;;  %v1460_v60 = vld.sshfl [vmem:[#allocation1 + $0x18] sm:$0xff pattern:$0x75316420] }
  0x4a   :  { %600 = vrot.lane.b32.xlu0 %v587_v47, %s3893_s0  ;;  %v3584_v47 = vld [vmem:[%s4751_s2 + $0x18] sm:$0xff] }
  0x4b   :  { %929 = vrot.lane.b32.xlu1 %v923_v40, %s3894_s22 }
  0x4c   :  { %931 = vrot.lane.b32.xlu2 %v924_v41, %s3894_s22  ;;  %v1461_v2 = vld.sshfl [vmem:[#allocation1 + $0x20] sm:$0xff pattern:$0x75316420]  ;;  %v1462_v11 = vld.sshfl [vmem:[#allocation1 + $0x28] sm:$0xff pattern:$0x75316420] }
  0x4e   :  { %v1457_v0 = vld.sshfl [vmem:[#allocation1] sm:$0xff pattern:$0x75316420]  ;;  %v1458_v1 = vld.sshfl [vmem:[#allocation1 + $0x8] sm:$0xff pattern:$0x75316420] }
  0x52   :  { %933 = vrot.lane.b32.xlu0 %v925_v37, %s3894_s22 }
  0x53   :  { %937 = vrot.lane.b32.xlu1 %v927_v39, %s3894_s22 }
  0x54   :  { %939 = vrot.lane.b32.xlu2 %v928_v42, %s3894_s22 }
  0x5a   :  { %935 = vrot.lane.b32.xlu0 %v926_v38, %s3894_s22 }
  0x5b   :  { %1111 = vrot.lane.b32.xlu1 %v1103_v43, %s3895_s23 }
  0x5c   :  { %1113 = vrot.lane.b32.xlu2 %v1104_v46, %s3895_s23 }
  0x62   :  { %1107 = vrot.lane.b32.xlu0 %v1101_v45, %s3895_s23 }
  0x63   :  { %1109 = vrot.lane.b32.xlu1 %v1102_v44, %s3895_s23 }
  0x64   :  { %1115 = vrot.lane.b32.xlu2 %v1105_v49, %s3895_s23 }
  0x66   :  { %v76_v56 = vpop.permute.xlu2 %75 }
  0x6a   :  { %1285 = vrot.lane.b32.xlu0 %v1279_v51, %s3896_s24 }
  0x6b   :  { %1287 = vrot.lane.b32.xlu1 %v1280_v48, %s3896_s24 }
  0x6c   :  { %1117 = vrot.lane.b32.xlu2 %v1106_v50, %s3895_s23 }
  0x6e   :  { %v234_v57 = vpop.permute.xlu2 %233 }
  0x72   :  { %1289 = vrot.lane.b32.xlu0 %v1281_v52, %s3896_s24 }
  0x73   :  { %1293 = vrot.lane.b32.xlu1 %v1283_v54, %s3896_s24 }
  0x74   :  { %1295 = vrot.lane.b32.xlu2 %v1284_v55, %s3896_s24 }
  0x76   :  { %v238_v58 = vpop.permute.xlu2 %237 }
  0x7a   :  { %1291 = vrot.lane.b32.xlu0 %v1282_v53, %s3896_s24 }
  0x7b   :  { %1467 = vrot.lane.b32.xlu1 %v1459_v59, %s3897_s25 }
  0x7c   :  { %v72_v61 = vpop.permute.xlu0 %71  ;;  %1469 = vrot.lane.b32.xlu2 %v1460_v60, %s3897_s25  ;;  %v3610_v60 = vld [vmem:[%s4751_s2 + $0x28] sm:$0xff] }
  0x7d   :  { %v68_v62 = vpop.permute.xlu1 %67 }
  0x7e   :  { %v240_v63 = vpop.permute.xlu2 %239 }
  0x7f   :  { %v248_v14 = vsel %vm245_vm3, %v238_v58, %v240_v63 }
  0x82   :  { %1463 = vrot.lane.b32.xlu0 %v1457_v0, %s3897_s25 }
  0x83   :  { %1465 = vrot.lane.b32.xlu1 %v1458_v1, %s3897_s25 }
  0x84   :  { %v74_v3 = vpop.permute.xlu0 %73  ;;  %1471 = vrot.lane.b32.xlu2 %v1461_v2, %s3897_s25 }
  0x85   :  { %v70_v4 = vpop.permute.xlu1 %69  ;;  %v82_v5 = vsel %vm79_vm0, %v72_v61, %v74_v3  ;;  %v83_v6 = vsel %vm79_vm0, %v74_v3, %v76_v56 }
  0x86   :  { %v80_v8 = vsel %vm79_vm0, %v68_v62, %v70_v4  ;;  %v81_v9 = vsel %vm79_vm0, %v70_v4, %v72_v61  ;;  %3551 = vmatpush.msk.msra.mxu2 %vm89_vm1, %v82_v5  ;;  %3553 = vmatpush.msk.msra.mxu3 %vm89_vm1, %v83_v6  ;;  %v406_v10 = vpop.permute.xlu2 %405  ;;  %v3623_v6 = vld [vmem:[%s4751_s2 + $0x30] sm:$0xff] }
  0x87   :  { %3547 = vmatpush.msk.msra.mxu0 %vm89_vm1, %v80_v8  ;;  %3549 = vmatpush.msk.msra.mxu1 %vm89_vm1, %v81_v9 }
  0x88   :  { %3552 = vmatmul.msk.f32.vlgmr.msra.gmra.mxu2 %vm85_vm2, %v3546_v7  ;;  %3554 = vmatmul.msk.f32.vlgmr.msra.gmra.mxu3 %vm85_vm2, %v3546_v7 }
  0x89   :  { %3548 = vmatmul.msk.f32.vlgmr.msra.gmra.mxu0 %vm85_vm2, %v3546_v7  ;;  %3550 = vmatmul.msk.f32.vlgmr.msra.gmra.mxu1 %vm85_vm2, %v3546_v7 }
  0x8a   :  { %1473 = vrot.lane.b32.xlu0 %v1462_v11, %s3897_s25 }
  0x8c   :  { %v236_v12 = vpop.permute.xlu0 %235 }
  0x8d   :  { %v78_v13 = vpop.permute.xlu1 %77  ;;  %v246_v15 = vsel %vm245_vm3, %v234_v57, %v236_v12  ;;  %v247_v16 = vsel %vm245_vm3, %v236_v12, %v238_v58 }
  0x8e   :  { %3557 = vmatpush.msk.msrb.mxu1 %vm89_vm1, %v78_v13  ;;  %v84_v18 = vsel %vm79_vm0, %v76_v56, %v78_v13  ;;  %3559 = vmatpush.msk.msrb.mxu2 %vm89_vm1, %v246_v15  ;;  %v589_v19 = vpop.permute.xlu2 %588  ;;  %v3597_v56 = vld [vmem:[%s4751_s2 + $0x20] sm:$0xff] }
  0x8f   :  { %3555 = vmatpush.msk.msrb.mxu0 %vm89_vm1, %v84_v18  ;;  %3561 = vmatpush.msk.msrb.mxu3 %vm89_vm1, %v247_v16 }
  0x90   :  { %3560 = vmatmul.msk.f32.vlgmr.msrb.gmra.mxu2 %vm85_vm2, %v50_v17  ;;  %3562 = vmatmul.msk.f32.vlgmr.msrb.gmra.mxu3 %vm85_vm2, %v50_v17 }
  0x91   :  { %3563 = vmatpush.msk.msra.mxu0 %vm89_vm1, %v248_v14  ;;  %3558 = vmatmul.msk.f32.vlgmr.msrb.gmra.mxu1 %vm85_vm2, %v3546_v7  ;;  %v3636_v14 = vld [vmem:[%s4751_s2 + $0x38] sm:$0xff] }
  0x92   :  { %3556 = vmatmul.msk.f32.vlgmr.msrb.gmra.mxu0 %vm85_vm2, %v3546_v7 }
  0x94   :  { %v242_v20 = vpop.permute.xlu0 %241 }
  0x95   :  { %v244_v21 = vpop.permute.xlu1 %243  ;;  %v249_v22 = vsel %vm245_vm3, %v240_v63, %v242_v20 }
  0x96   :  { %v250_v23 = vsel %vm245_vm3, %v242_v20, %v244_v21  ;;  %3569 = vmatpush.msk.msra.mxu3 %vm89_vm1, %v244_v21  ;;  %3565 = vmatpush.msk.msra.mxu1 %vm89_vm1, %v249_v22  ;;  %v593_v24 = vpop.permute.xlu2 %592 }
  0x97   :  { %3567 = vmatpush.msk.msra.mxu2 %vm89_vm1, %v250_v23 }
  0x98   :  { %3568 = vmatmul.msk.f32.vlgmr.msra.gmra.mxu2 %vm85_vm2, %v50_v17  ;;  %3570 = vmatmul.msk.f32.vlgmr.msra.gmra.mxu3 %vm85_vm2, %v50_v17 }
  0x99   :  { %3566 = vmatmul.msk.f32.vlgmr.msra.gmra.mxu1 %vm85_vm2, %v50_v17 }
  0x9a   :  { %3564 = vmatmul.msk.f32.vlgmr.msra.gmra.mxu0 %vm85_vm2, %v50_v17 }
  0x9c   :  { %v410_v25 = vpop.permute.xlu0 %409 }
  0x9d   :  { %v412_v26 = vpop.permute.xlu1 %411 }
  0x9e   :  { %v420_v28 = vsel %vm417_vm4, %v410_v25, %v412_v26  ;;  %v595_v29 = vpop.permute.xlu2 %594 }
  0x9f   :  { %3576 = vmatpush.msk.msrb.mxu2 %vm89_vm1, %v420_v28  ;;  %v605_v49 = vsel %vm602_vm5, %v593_v24, %v595_v29 }
  0xa0   :  { %3577 = vmatmul.msk.f32.vlgmr.msrb.gmra.mxu2 %vm85_vm2, %v3571_v27 }
  0xa4   :  { %v408_v30 = vpop.permute.xlu0 %407 }
  0xa5   :  { %v414_v37 = vpop.permute.xlu1 %413  ;;  %v418_v38 = vsel %vm417_vm4, %v406_v10, %v408_v30  ;;  %v419_v39 = vsel %vm417_vm4, %v408_v30, %v410_v25 }
  0xa6   :  { %v421_v40 = vsel %vm417_vm4, %v412_v26, %v414_v37  ;;  %3572 = vmatpush.msk.msrb.mxu0 %vm89_vm1, %v418_v38  ;;  %3574 = vmatpush.msk.msrb.mxu1 %vm89_vm1, %v419_v39  ;;  %v932_v41 = vpop.permute.xlu2 %931  ;;  %v3649_v26 = vld [vmem:[%s4751_s2 + $0x40] sm:$0xff] }
  0xa7   :  { %3578 = vmatpush.msk.msrb.mxu3 %vm89_vm1, %v421_v40  ;;  %3573 = vmatmul.msk.f32.vlgmr.msrb.gmra.mxu0 %vm85_vm2, %v3571_v27 }
  0xa8   :  { %3575 = vmatmul.msk.f32.vlgmr.msrb.gmra.mxu1 %vm85_vm2, %v3571_v27  ;;  %3579 = vmatmul.msk.f32.vlgmr.msrb.gmra.mxu3 %vm85_vm2, %v3571_v27 }
  0xac   :  { %v591_v42 = vpop.permute.xlu0 %590 }
  0xad   :  { %v416_v43 = vpop.permute.xlu1 %415  ;;  %v603_v44 = vsel %vm602_vm5, %v589_v19, %v591_v42  ;;  %v604_v45 = vsel %vm602_vm5, %v591_v42, %v593_v24 }
  0xae   :  { %v422_v46 = vsel %vm417_vm4, %v414_v37, %v416_v43  ;;  %3582 = vmatpush.msk.msra.mxu1 %vm89_vm1, %v416_v43  ;;  %3585 = vmatpush.msk.msra.mxu2 %vm89_vm1, %v603_v44  ;;  %v940_v48 = vpop.permute.xlu2 %939 }
  0xaf   :  { %3580 = vmatpush.msk.msra.mxu0 %vm89_vm1, %v422_v46  ;;  %3587 = vmatpush.msk.msra.mxu3 %vm89_vm1, %v604_v45 }
  0xb0   :  { %3581 = vmatmul.msk.f32.vlgmr.msra.gmra.mxu0 %vm85_vm2, %v3571_v27  ;;  %3583 = vmatmul.msk.f32.vlgmr.msra.gmra.mxu1 %vm85_vm2, %v3571_v27 }
  0xb1   :  { %3586 = vmatmul.msk.f32.vlgmr.msra.gmra.mxu2 %vm85_vm2, %v3584_v47  ;;  %3588 = vmatmul.msk.f32.vlgmr.msra.gmra.mxu3 %vm85_vm2, %v3584_v47 }
  0xb2   :  { %3589 = vmatpush.msk.msrb.mxu0 %vm89_vm1, %v605_v49 }
  0xb4   :  { %3598 = vmatpush.msk.msra.mxu0 %vm89_vm1, %v3989_v33  ;;  %v597_v50 = vpop.permute.xlu0 %596 }
  0xb5   :  { %v599_v51 = vpop.permute.xlu1 %598  ;;  %v606_v52 = vsel %vm602_vm5, %v595_v29, %v597_v50 }
  0xb6   :  { %v607_v53 = vsel %vm602_vm5, %v597_v50, %v599_v51  ;;  %3591 = vmatpush.msk.msrb.mxu1 %vm89_vm1, %v606_v52  ;;  %v1114_v54 = vpop.permute.xlu2 %1113 }
  0xb7   :  { %3593 = vmatpush.msk.msrb.mxu2 %vm89_vm1, %v607_v53 }
  0xb8   :  { %3600 = vmatpush.msk.msra.mxu1 %vm89_vm1, %v3991_v34  ;;  %3590 = vmatmul.msk.f32.vlgmr.msrb.gmra.mxu0 %vm85_vm2, %v3584_v47 }
  0xb9   :  { %3592 = vmatmul.msk.f32.vlgmr.msrb.gmra.mxu1 %vm85_vm2, %v3584_v47  ;;  %3594 = vmatmul.msk.f32.vlgmr.msrb.gmra.mxu2 %vm85_vm2, %v3584_v47 }
  0xba   :  { %3606 = vmatpush.msk.msrb.mxu0 %vm89_vm1, %v3984_v31  ;;  %3602 = vmatpush.msk.msra.mxu2 %vm89_vm1, %v3993_v35 }
  0xbb   :  { %3608 = vmatpush.msk.msrb.mxu1 %vm89_vm1, %v3986_v32 }
  0xbc   :  { %v601_v33 = vpop.permute.xlu0 %600 }
  0xbd   :  { %v608_v55 = vsel %vm602_vm5, %v599_v51, %v601_v33  ;;  %v930_v34 = vpop.permute.xlu1 %929 }
  0xbe   :  { %v942_v57 = vsel %vm941_vm6, %v930_v34, %v932_v41  ;;  %3595 = vmatpush.msk.msrb.mxu3 %vm89_vm1, %v608_v55  ;;  %v1116_v31 = vpop.permute.xlu2 %1115 }
  0xbf   :  { %3611 = vmatpush.msk.msrb.mxu2 %vm89_vm1, %v942_v57  ;;  %3596 = vmatmul.msk.f32.vlgmr.msrb.gmra.mxu3 %vm85_vm2, %v3584_v47  ;;  %v1123_v1 = vsel %vm1119_vm7, %v1114_v54, %v1116_v31 }
  0xc0   :  { %3599 = vmatmul.msk.f32.vlgmr.msra.gmra.mxu0 %vm85_vm2, %v3597_v56  ;;  %3604 = vmatpush.msk.msra.mxu3 %vm89_vm1, %v3995_v36 }
  0xc1   :  { %3601 = vmatmul.msk.f32.vlgmr.msra.gmra.mxu1 %vm85_vm2, %v3597_v56  ;;  %3603 = vmatmul.msk.f32.vlgmr.msra.gmra.mxu2 %vm85_vm2, %v3597_v56 }
  0xc4   :  { %v934_v32 = vpop.permute.xlu0 %933 }
  0xc5   :  { %v943_v35 = vsel %vm941_vm6, %v932_v41, %v934_v32  ;;  %v938_v58 = vpop.permute.xlu1 %937 }
  0xc6   :  { %v946_v59 = vsel %vm941_vm6, %v938_v58, %v940_v48  ;;  %3613 = vmatpush.msk.msrb.mxu3 %vm89_vm1, %v943_v35  ;;  %v1118_v61 = vpop.permute.xlu2 %1117 }
  0xc7   :  { %3619 = vmatpush.msk.msra.mxu2 %vm89_vm1, %v946_v59  ;;  %3605 = vmatmul.msk.f32.vlgmr.msra.gmra.mxu3 %vm85_vm2, %v3597_v56  ;;  %v1124_v9 = vsel %vm1119_vm7, %v1116_v31, %v1118_v61 }
  0xc8   :  { %3607 = vmatmul.msk.f32.vlgmr.msrb.gmra.mxu0 %vm85_vm2, %v3597_v56  ;;  %3621 = vmatpush.msk.msra.mxu3 %vm89_vm1, %v940_v48 }
  0xc9   :  { %3609 = vmatmul.msk.f32.vlgmr.msrb.gmra.mxu1 %vm85_vm2, %v3597_v56  ;;  %3612 = vmatmul.msk.f32.vlgmr.msrb.gmra.mxu2 %vm85_vm2, %v3610_v60 }
  0xcc   :  { %v936_v36 = vpop.permute.xlu0 %935 }
  0xcd   :  { %v944_v62 = vsel %vm941_vm6, %v934_v32, %v936_v36  ;;  %v945_v63 = vsel %vm941_vm6, %v936_v36, %v938_v58  ;;  %v1112_v0 = vpop.permute.xlu1 %1111 }
  0xce   :  { %v1122_v2 = vsel %vm1119_vm7, %v1112_v0, %v1114_v54  ;;  %3615 = vmatpush.msk.msra.mxu0 %vm89_vm1, %v944_v62  ;;  %3617 = vmatpush.msk.msra.mxu1 %vm89_vm1, %v945_v63  ;;  %v1296_v3 = vpop.permute.xlu2 %1295 }
  0xcf   :  { %3628 = vmatpush.msk.msrb.mxu2 %vm89_vm1, %v1122_v2  ;;  %3614 = vmatmul.msk.f32.vlgmr.msrb.gmra.mxu3 %vm85_vm2, %v3610_v60 }
  0xd0   :  { %3616 = vmatmul.msk.f32.vlgmr.msra.gmra.mxu0 %vm85_vm2, %v3610_v60  ;;  %3630 = vmatpush.msk.msrb.mxu3 %vm89_vm1, %v1123_v1 }
  0xd1   :  { %3618 = vmatmul.msk.f32.vlgmr.msra.gmra.mxu1 %vm85_vm2, %v3610_v60  ;;  %3620 = vmatmul.msk.f32.vlgmr.msra.gmra.mxu2 %vm85_vm2, %v3610_v60 }
  0xd4   :  { %v1108_v4 = vpop.permute.xlu0 %1107 }
  0xd5   :  { %v1110_v5 = vpop.permute.xlu1 %1109 }
  0xd6   :  { %v1121_v7 = vsel %vm1119_vm7, %v1110_v5, %v1112_v0  ;;  %v1120_v8 = vsel %vm1119_vm7, %v1108_v4, %v1110_v5  ;;  %v1470_v10 = vpop.permute.xlu2 %1469 }
  0xd7   :  { %3624 = vmatpush.msk.msrb.mxu0 %vm89_vm1, %v1120_v8  ;;  %3626 = vmatpush.msk.msrb.mxu1 %vm89_vm1, %v1121_v7 }
  0xd8   :  { %3622 = vmatmul.msk.f32.vlgmr.msra.gmra.mxu3 %vm85_vm2, %v3610_v60  ;;  %3625 = vmatmul.msk.f32.vlgmr.msrb.gmra.mxu0 %vm85_vm2, %v3623_v6 }
  0xd9   :  { %3627 = vmatmul.msk.f32.vlgmr.msrb.gmra.mxu1 %vm85_vm2, %v3623_v6  ;;  %3629 = vmatmul.msk.f32.vlgmr.msrb.gmra.mxu2 %vm85_vm2, %v3623_v6 }
  0xda   :  { %3632 = vmatpush.msk.msra.mxu0 %vm89_vm1, %v1124_v9  ;;  %3634 = vmatpush.msk.msra.mxu1 %vm89_vm1, %v1118_v61 }
  0xdc   :  { %v1286_v11 = vpop.permute.xlu0 %1285 }
  0xdd   :  { %v1288_v12 = vpop.permute.xlu1 %1287 }
  0xde   :  { %v1298_v13 = vsel %vm1297_vm8, %v1286_v11, %v1288_v12  ;;  %v1472_v15 = vpop.permute.xlu2 %1471 }
  0xdf   :  { %3637 = vmatpush.msk.msra.mxu2 %vm89_vm1, %v1298_v13  ;;  %v1479_v20 = vsel %vm1475_vm9, %v1470_v10, %v1472_v15 }
  0xe0   :  { %3631 = vmatmul.msk.f32.vlgmr.msrb.gmra.mxu3 %vm85_vm2, %v3623_v6  ;;  %3633 = vmatmul.msk.f32.vlgmr.msra.gmra.mxu0 %vm85_vm2, %v3623_v6 }
  0xe1   :  { %3635 = vmatmul.msk.f32.vlgmr.msra.gmra.mxu1 %vm85_vm2, %v3623_v6  ;;  %3638 = vmatmul.msk.f32.vlgmr.msra.gmra.mxu2 %vm85_vm2, %v3636_v14 }
  0xe4   :  { %v1290_v16 = vpop.permute.xlu0 %1289 }
  0xe5   :  { %v1294_v17 = vpop.permute.xlu1 %1293  ;;  %v1299_v18 = vsel %vm1297_vm8, %v1288_v12, %v1290_v16 }
  0xe6   :  { %v1302_v19 = vsel %vm1297_vm8, %v1294_v17, %v1296_v3  ;;  %3639 = vmatpush.msk.msra.mxu3 %vm89_vm1, %v1299_v18 }
  0xe7   :  { %3645 = vmatpush.msk.msrb.mxu2 %vm89_vm1, %v1302_v19 }
  0xe8   :  { %3647 = vmatpush.msk.msrb.mxu3 %vm89_vm1, %v1296_v3 }
  0xe9   :  { %3640 = vmatmul.msk.f32.vlgmr.msra.gmra.mxu3 %vm85_vm2, %v3636_v14  ;;  %3646 = vmatmul.msk.f32.vlgmr.msrb.gmra.mxu2 %vm85_vm2, %v3636_v14 }
  0xea   :  { %3656 = vmatpush.msk.msra.mxu3 %vm89_vm1, %v1479_v20 }
  0xec   :  { %v1292_v21 = vpop.permute.xlu0 %1291 }
  0xed   :  { %v1468_v22 = vpop.permute.xlu1 %1467  ;;  %v1300_v23 = vsel %vm1297_vm8, %v1290_v16, %v1292_v21  ;;  %v1301_v24 = vsel %vm1297_vm8, %v1292_v21, %v1294_v17 }
  0xee   :  { %v1478_v25 = vsel %vm1475_vm9, %v1468_v22, %v1470_v10  ;;  %3641 = vmatpush.msk.msrb.mxu0 %vm89_vm1, %v1300_v23  ;;  %3643 = vmatpush.msk.msrb.mxu1 %vm89_vm1, %v1301_v24 }
  0xef   :  { %3654 = vmatpush.msk.msra.mxu2 %vm89_vm1, %v1478_v25  ;;  %3642 = vmatmul.msk.f32.vlgmr.msrb.gmra.mxu0 %vm85_vm2, %v3636_v14 }
  0xf0   :  { %3644 = vmatmul.msk.f32.vlgmr.msrb.gmra.mxu1 %vm85_vm2, %v3636_v14 }
  0xf1   :  { %3648 = vmatmul.msk.f32.vlgmr.msrb.gmra.mxu3 %vm85_vm2, %v3636_v14  ;;  %3655 = vmatmul.msk.f32.vlgmr.msra.gmra.mxu2 %vm85_vm2, %v3649_v26 }
  0xf4   :  { %v1464_v27 = vpop.permute.xlu0 %1463 }
  0xf5   :  { %v1466_v28 = vpop.permute.xlu1 %1465 }
  0xf6   :  { %v1477_v29 = vsel %vm1475_vm9, %v1466_v28, %v1468_v22  ;;  %v1476_v30 = vsel %vm1475_vm9, %v1464_v27, %v1466_v28 }
  0xf7   :  { %3650 = vmatpush.msk.msra.mxu0 %vm89_vm1, %v1476_v30  ;;  %3652 = vmatpush.msk.msra.mxu1 %vm89_vm1, %v1477_v29 }
  0xf8   :  { %3651 = vmatmul.msk.f32.vlgmr.msra.gmra.mxu0 %vm85_vm2, %v3649_v26  ;;  %3653 = vmatmul.msk.f32.vlgmr.msra.gmra.mxu1 %vm85_vm2, %v3649_v26 }
  0xf9   :  { %3657 = vmatmul.msk.f32.vlgmr.msra.gmra.mxu3 %vm85_vm2, %v3649_v26 }
  0xfc   :  { %v1474_v37 = vpop.permute.xlu0 %1473 }
  0xfd   :  { %v1480_v38 = vsel %vm1475_vm9, %v1472_v15, %v1474_v37  ;;  %3660 = vmatpush.msk.msrb.mxu1 %vm89_vm1, %v1474_v37 }
  0xfe   :  { %3658 = vmatpush.msk.msrb.mxu0 %vm89_vm1, %v1480_v38 }
 0x100   :  { %3659 = vmatmul.msk.f32.vlgmr.msrb.gmra.mxu0 %vm85_vm2, %v3649_v26  ;;  %3661 = vmatmul.msk.f32.vlgmr.msrb.gmra.mxu1 %vm85_vm2, %v3649_v26 }
 0x106   :  { %v119_v39 = vpop.f32.mrf.mxu0  ;;  %v139_v40 = vpop.f32.mrf.mxu1 }
 0x10b   :  { %v159_v41 = vpop.f32.mrf.mxu2  ;;  %v179_v44 = vpop.f32.mrf.mxu3 }
 0x10e   :  { %v219_v43 = vpop.f32.mrf.mxu1 }
 0x10f   :  { %v199_v42 = vpop.f32.mrf.mxu0 }
 0x113   :  { %v283_v45 = vpop.f32.mrf.mxu2  ;;  %v303_v48 = vpop.f32.mrf.mxu3 }
 0x114   :  { %v304_v12 = vadd.f32 %v303_v48, %v139_v40  ;;  %v284_v13 = vadd.f32 %v283_v45, %v119_v39 }
 0x116   :  { %v343_v47 = vpop.f32.mrf.mxu1 }
 0x117   :  { %v323_v46 = vpop.f32.mrf.mxu0  ;;  %v344_v24 = vadd.f32 %v343_v47, %v179_v44  ;;  %v29_v47 = vld [vmem:[%s4752_s1] sm:$0x3f] }
 0x118   :  { %v324_v17 = vadd.f32 %v323_v46, %v159_v41 }
 0x11b   :  { %v363_v49 = vpop.f32.mrf.mxu2  ;;  %v383_v52 = vpop.f32.mrf.mxu3 }
 0x11c   :  { %v384_v18 = vadd.f32 %v383_v52, %v219_v43  ;;  %v364_v30 = vadd.f32 %v363_v49, %v199_v42  ;;  %v4219_v49 = vperm.slane %v29_v47, 0 }
 0x123   :  { %v495_v53 = vpop.f32.mrf.mxu2 }
 0x124   :  { %v455_v50 = vpop.f32.mrf.mxu0  ;;  %v560_v25 = vadd.f32 %v495_v53, %v324_v17 }
 0x125   :  { %v475_v51 = vpop.f32.mrf.mxu1  ;;  %v558_v15 = vadd.f32 %v455_v50, %v284_v13 }
 0x126   :  { %v559_v14 = vadd.f32 %v475_v51, %v304_v12 }
 0x12b   :  { %v515_v55 = vpop.f32.mrf.mxu3 }
 0x12c   :  { %v561_v37 = vadd.f32 %v515_v55, %v344_v24 }
 0x12d   :  { %v535_v54 = vpop.f32.mrf.mxu0  ;;  %v555_v33 = vpop.f32.mrf.mxu1 }
 0x12e   :  { %v563_v26 = vadd.f32 %v555_v33, %v384_v18  ;;  %v562_v45 = vadd.f32 %v535_v54, %v364_v30  ;;  %v4221_v33 = vperm.slane %v29_v47, 1 }
 0x134   :  { %v641_v34 = vpop.f32.mrf.mxu2  ;;  %v661_v31 = vpop.f32.mrf.mxu3 }
 0x135   :  { %v681_v56 = vpop.f32.mrf.mxu0  ;;  %v745_v16 = vadd.f32 %v661_v31, %v559_v14  ;;  %v744_v20 = vadd.f32 %v641_v34, %v558_v15 }
 0x136   :  { %v701_v57 = vpop.f32.mrf.mxu1  ;;  %v746_v38 = vadd.f32 %v681_v56, %v560_v25 }
 0x137   :  { %v747_v48 = vadd.f32 %v701_v57, %v561_v37 }
 0x13c   :  { %v721_v32 = vpop.f32.mrf.mxu2 }
 0x13d   :  { %v801_v35 = vpop.f32.mrf.mxu0  ;;  %v748_v50 = vadd.f32 %v721_v32, %v562_v45 }
 0x13e   :  { %v821_v58 = vpop.f32.mrf.mxu1  ;;  %v904_v28 = vadd.f32 %v801_v35, %v744_v20 }
 0x13f   :  { %v905_v21 = vadd.f32 %v821_v58, %v745_v16 }
 0x142   :  { %v741_v59 = vpop.f32.mrf.mxu3 }
 0x143   :  { %v749_v39 = vadd.f32 %v741_v59, %v563_v26 }
 0x144   :  { %v841_v60 = vpop.f32.mrf.mxu2 }
 0x145   :  { %v881_v61 = vpop.f32.mrf.mxu0  ;;  %v906_v41 = vadd.f32 %v841_v60, %v746_v38 }
 0x146   :  { %v901_v36 = vpop.f32.mrf.mxu1  ;;  %v908_v57 = vadd.f32 %v881_v61, %v748_v50  ;;  %v4227_v61 = vperm.slane %v29_v47, 3 }
 0x147   :  { %v909_v51 = vadd.f32 %v901_v36, %v749_v39 }
 0x14a   :  { %v861_v62 = vpop.f32.mrf.mxu3 }
 0x14b   :  { %v907_v52 = vadd.f32 %v861_v62, %v747_v48 }
 0x14c   :  { %v979_v63 = vpop.f32.mrf.mxu2 }
 0x14d   :  { %v1019_v0 = vpop.f32.mrf.mxu0  ;;  %v1082_v40 = vadd.f32 %v979_v63, %v904_v28 }
 0x14e   :  { %v1039_v1 = vpop.f32.mrf.mxu1  ;;  %v1084_v34 = vadd.f32 %v1019_v0, %v906_v41 }
 0x14f   :  { %v1085_v59 = vadd.f32 %v1039_v1, %v907_v52  ;;  %v4229_v1 = vperm.slane %v29_v47, 4 }
 0x152   :  { %v999_v2 = vpop.f32.mrf.mxu3 }
 0x153   :  { %v1083_v29 = vadd.f32 %v999_v2, %v905_v21 }
 0x154   :  { %v1059_v3 = vpop.f32.mrf.mxu2 }
 0x155   :  { %v1157_v4 = vpop.f32.mrf.mxu0  ;;  %v1086_v36 = vadd.f32 %v1059_v3, %v908_v57  ;;  %v4231_v3 = vperm.slane %v29_v47, 5 }
 0x156   :  { %v1177_v5 = vpop.f32.mrf.mxu1  ;;  %v1260_v43 = vadd.f32 %v1157_v4, %v1082_v40  ;;  %v4225_v4 = vperm.slane %v29_v47, 2 }
 0x157   :  { %v1261_v46 = vadd.f32 %v1177_v5, %v1083_v29 }
 0x15b   :  { %v1079_v6 = vpop.f32.mrf.mxu3 }
 0x15c   :  { %v1197_v7 = vpop.f32.mrf.mxu2  ;;  %v1087_v31 = vadd.f32 %v1079_v6, %v909_v51 }
 0x15d   :  { %v1237_v9 = vpop.f32.mrf.mxu0  ;;  %v1262_v54 = vadd.f32 %v1197_v7, %v1084_v34 }
 0x15e   :  { %v1257_v11 = vpop.f32.mrf.mxu1  ;;  %v1264_v5 = vadd.f32 %v1237_v9, %v1086_v36 }
 0x15f   :  { %v1265_v7 = vadd.f32 %v1257_v11, %v1087_v31  ;;  %v3898_v31 = vmov 0  }
 0x160   :  { %3796 = vset.pattern.permute.xlu0 %v3898_v31  ;;  %3883 = vset.pattern.permute.xlu1 %v3898_v31 }
 0x161   :  { %3882 = vset.pattern.permute.xlu2 %v3898_v31 }
 0x163   :  { %v1217_v8 = vpop.f32.mrf.mxu3 }
 0x164   :  { %v1335_v10 = vpop.f32.mrf.mxu2  ;;  %v1263_v0 = vadd.f32 %v1217_v8, %v1085_v59 }
 0x165   :  { %v1438_v53 = vadd.f32 %v1335_v10, %v1260_v43 }
 0x16c   :  { %v1355_v19 = vpop.f32.mrf.mxu3  ;;  %v1415_v22 = vpop.f32.mrf.mxu2 }
 0x16d   :  { %v1375_v23 = vpop.f32.mrf.mxu0  ;;  %v1395_v27 = vpop.f32.mrf.mxu1  ;;  %v1439_v42 = vadd.f32 %v1355_v19, %v1261_v46  ;;  %v1442_v6 = vadd.f32 %v1415_v22, %v1264_v5 }
 0x16e   :  { %v1440_v60 = vadd.f32 %v1375_v23, %v1262_v54  ;;  %v1441_v10 = vadd.f32 %v1395_v27, %v1263_v0  ;;  %v1677_v0 = vld [vmem:[%s4753_s3] sm:$0xff] }
 0x174   :  { %v1435_v44 = vpop.f32.mrf.mxu3  ;;  %v1553_v32 = vpop.f32.mrf.mxu2 }
 0x175   :  { %v1513_v55 = vpop.f32.mrf.mxu0  ;;  %v1533_v56 = vpop.f32.mrf.mxu1  ;;  %v1618_v2 = vadd.f32 %v1553_v32, %v1440_v60  ;;  %v1443_v13 = vadd.f32 %v1435_v44, %v1265_v7 }
 0x176   :  { %v1616_v35 = vadd.f32 %v1513_v55, %v1438_v53  ;;  %v1617_v58 = vadd.f32 %v1533_v56, %v1439_v42 }
 0x177   :  { %v1637_v15 = vmul.f32 %v4225_v4, %v1618_v2 }
 0x178   :  { %v1635_v62 = vmul.f32 %v4219_v49, %v1616_v35  ;;  %v1636_v63 = vmul.f32 %v4221_v33, %v1617_v58 }
 0x17a   :  { %v1641_v12 = vadd.f32 %v1636_v63, %v1635_v62 }
 0x17c   :  { %v1573_v14 = vpop.f32.mrf.mxu3  ;;  %v1642_v11 = vadd.f32 %v1641_v12, %v1637_v15  ;;  %v3899_v12 = vmov 0.0  }
 0x17d   :  { %v1619_v16 = vadd.f32 %v1573_v14, %v1441_v10  ;;  %v1593_v8 = vpop.f32.mrf.mxu0  ;;  %v1613_v17 = vpop.f32.mrf.mxu1  ;;  %v1701_v10 = vld [vmem:[%s4754_s4] sm:$0xff]  ;;  %36 = vst [vmem:[#allocation2 + $0x30] sm:$0xff] %v3899_v12 }
 0x17e   :  { %v1620_v18 = vadd.f32 %v1593_v8, %v1442_v6  ;;  %v1621_v19 = vadd.f32 %v1613_v17, %v1443_v13 }
 0x17f   :  { %v1638_v9 = vmul.f32 %v4227_v61, %v1619_v16 }
 0x180   :  { %v1639_v20 = vmul.f32 %v4229_v1, %v1620_v18  ;;  %v1640_v21 = vmul.f32 %v4231_v3, %v1621_v19 }
 0x181   :  { %v1643_v22 = vadd.f32 %v1642_v11, %v1638_v9 }
 0x182   :  { %v1645_v23 = vsel %vm37_vm10, %v1640_v21, 0.0 }
 0x183   :  { %v1644_v24 = vadd.f32 %v1643_v22, %v1639_v20 }
 0x185   :  { %v1646_v25 = vadd.f32 %v1645_v23, %v1644_v24 }
 0x187   :  { %1647 = vadd.xlane.f32.xlu1 %v1646_v25 }
 0x1fa   :  { %v1648_v26 = vpop.xlane.xlu1 %1647 }
 0x1fb   :  { %v1649_v27 = vmul.f32 0.001953125, %v1648_v26 }
 0x1fd   :  { %v1650_v28 = vsub.f32 %v1616_v35, %v1649_v27  ;;  %v1651_v29 = vsub.f32 %v1617_v58, %v1649_v27  ;;  %v1652_v30 = vsub.f32 %v1618_v2, %v1649_v27  ;;  %v1653_v37 = vsub.f32 %v1619_v16, %v1649_v27 }
 0x1fe   :  { %v1655_v38 = vsub.f32 %v1621_v19, %v1649_v27  ;;  %v1654_v39 = vsub.f32 %v1620_v18, %v1649_v27 }
 0x1ff   :  { %v1656_v40 = vmul.f32 %v1650_v28, %v4219_v49  ;;  %v1657_v45 = vmul.f32 %v1651_v29, %v4221_v33  ;;  %v1658_v48 = vmul.f32 %v1652_v30, %v4225_v4  ;;  %v1659_v41 = vmul.f32 %v1653_v37, %v4227_v61 }
 0x200   :  { %v1661_v50 = vmul.f32 %v1655_v38, %v4231_v3  ;;  %v1660_v51 = vmul.f32 %v1654_v39, %v4229_v1 }
 0x201   :  { %v1662_v43 = vmul.f32 %v1656_v40, %v1656_v40  ;;  %v1663_v46 = vmul.f32 %v1657_v45, %v1657_v45  ;;  %v1664_v52 = vmul.f32 %v1658_v48, %v1658_v48  ;;  %v1665_v44 = vmul.f32 %v1659_v41, %v1659_v41 }
 0x202   :  { %v1667_v53 = vmul.f32 %v1661_v50, %v1661_v50  ;;  %v1666_v42 = vmul.f32 %v1660_v51, %v1660_v51 }
 0x203   :  { %v1668_v34 = vadd.f32 %v1663_v46, %v1662_v43 }
 0x204   :  { %v1672_v56 = vsel %vm37_vm10, %v1667_v53, 0.0 }
 0x205   :  { %v1669_v47 = vadd.f32 %v1668_v34, %v1664_v52 }
 0x207   :  { %v1670_v54 = vadd.f32 %v1669_v47, %v1665_v44 }
 0x209   :  { %v1671_v55 = vadd.f32 %v1670_v54, %v1666_v42 }
 0x20b   :  { %v1673_v57 = vadd.f32 %v1672_v56, %v1671_v55  ;;  %v3662_v55 = vld [vmem:[%s4755_s5 + $0x10] sm:$0xff] }
 0x20d   :  { %1674 = vadd.xlane.f32.xlu2 %v1673_v57 }
 0x280   :  { %v1675_v32 = vpop.xlane.xlu2 %1674 }
 0x281   :  { %v1676_v35 = vmul.f32 0.001953125, %v1675_v32 }
 0x283   :  { %v1678_v58 = vadd.f32 1e-05, %v1676_v35 }
 0x285   :  { %3884 = vrsqrt.f32 %v1678_v58  ;;  %vm1685_vm12 = vweird.f32 %v1678_v58 }
 0x28b   :  { %v3885_v59 = vpop.eup %3884 }
 0x28c   :  { %v1680_v60 = vmul.f32 %v3885_v59, %v1678_v58  ;;  %vm1686_vm11 = vweird.f32 %v3885_v59 }
 0x28d   :  { %vm1687_vm13 = vmor %vm1685_vm12, %vm1686_vm11 }
 0x28e   :  { %v1681_v36 = vmul.f32 %v3885_v59, %v1680_v60 }
 0x290   :  { %v1682_v62 = vmul.f32 0.5, %v1681_v36 }
 0x292   :  { %v1683_v63 = vsub.f32 1.5, %v1682_v62 }
 0x294   :  { %v1684_v2 = vmul.f32 %v3885_v59, %v1683_v63 }
 0x296   :  { %v1688_v5 = vsel %vm1687_vm13, %v3885_v59, %v1684_v2  ;;  %v3663_v59 = vld [vmem:[%s4755_s5 + $0x18] sm:$0xff] }
 0x297   :  { %v1689_v7 = vmul.f32 %v1688_v5, %v1677_v0 }
 0x299   :  { %1692 = vperm.xlu0 %3796, %v1689_v7  }
 0x2a1   :  { %1704 = vperm.xlu0 %3796, %v1701_v10  }
 0x30b   :  { %v1693_v6 = vpop.permute.xlu0 %1692 }
 0x30c   :  { %v1695_v13 = vmul.f32 %v1693_v6, %v1656_v40  ;;  %v1696_v14 = vmul.f32 %v1693_v6, %v1657_v45  ;;  %v1697_v15 = vmul.f32 %v1693_v6, %v1658_v48  ;;  %v1698_v16 = vmul.f32 %v1693_v6, %v1659_v41 }
 0x30d   :  { %v1699_v8 = vmul.f32 %v1693_v6, %v1660_v51  ;;  %v1700_v17 = vmul.f32 %v1693_v6, %v1661_v50 }
 0x313   :  { %v1705_v18 = vpop.permute.xlu0 %1704 }
 0x314   :  { %v1707_v19 = vadd.f32 %v1705_v18, %v1695_v13  ;;  %v1708_v9 = vadd.f32 %v1705_v18, %v1696_v14  ;;  %v1709_v11 = vadd.f32 %v1705_v18, %v1697_v15  ;;  %v1710_v20 = vadd.f32 %v1705_v18, %v1698_v16 }
 0x315   :  { %v1711_v21 = vadd.f32 %v1705_v18, %v1699_v8  ;;  %v1712_v22 = vadd.f32 %v1705_v18, %v1700_v17 }
 0x316   :  { %v1713_v23 = vmax.f32 %v1707_v19, 0.0  ;;  %v1714_v24 = vmax.f32 %v1708_v9, 0.0  ;;  %v1715_v25 = vmax.f32 %v1709_v11, 0.0  ;;  %v1716_v26 = vmax.f32 %v1710_v20, 0.0  ;;  %v1737_v19 = vld [vmem:[%s4755_s5] sm:$0xff] }
 0x317   :  { %v1717_v27 = vmax.f32 %v1711_v21, 0.0  ;;  %v1718_v28 = vmax.f32 %v1712_v22, 0.0 }
 0x318   :  { %v4252_v29 = vmul.f32 %v1713_v23, %v4219_v49  ;;  %v4255_v30 = vmul.f32 %v1714_v24, %v4221_v33  ;;  %v4258_v37 = vmul.f32 %v1715_v25, %v4225_v4  ;;  %v4261_v38 = vmul.f32 %v1716_v26, %v4227_v61  ;;  %v1738_v25 = vld [vmem:[%s4755_s5 + $0x8] sm:$0xff] }
 0x319   :  { %v4264_v39 = vmul.f32 %v1717_v27, %v4229_v1  ;;  %v1724_v45 = vmul.f32 %v1718_v28, %v4231_v3 }
 0x31a   :  { %1754 = vrot.lane.b32.xlu1 %v4258_v37, %s3890_s11  ;;  %v3797_v40 = vpack.i.bf16 %v4252_v29, %v3899_v12  ;;  %v3807_v41 = vpack.i.bf16 %v4258_v37, %v4255_v30  ;;  %v3832_v43 = vpack.i.bf16 0.0, %v4261_v38  ;;  %v3842_v50 = vpack.i.bf16 %v4261_v38, %v4258_v37 }
 0x31b   :  { %v3802_v48 = vpack.i.bf16 %v4264_v39, %v4261_v38  ;;  %1730 = vst.msk [vmem:[#allocation2 + $0x30] sm:$0xff] %vm37_vm10, %v1724_v45  ;;  %v3847_v46 = vpack.i.bf16 %v4252_v29, %v4264_v39  ;;  %v3852_v51 = vpack.i.bf16 %v4255_v30, %v4252_v29 }
 0x31c   :  { %3798 = vrot.lane.b32.xlu0 %v3797_v40, %s3890_s11 }
 0x31d   :  { %3803 = vrot.lane.b32.xlu2 %v3802_v48, %s3890_s11 }
 0x322   :  { %2089 = vrot.lane.b32.xlu1 %v4255_v30, %s3892_s21  ;;  %v4306_v52 = vld [vmem:[#allocation2 + $0x30] sm:$0xff] }
 0x323   :  { %v3857_v34 = vpack.i.bf16 %v4306_v52, %v4264_v39 }
 0x324   :  { %1752 = vrot.lane.b32.xlu0 %v4255_v30, %s3890_s11 }
 0x325   :  { %3818 = vrot.lane.b32.xlu2 %v3797_v40, %s3892_s21 }
 0x32a   :  { %2091 = vrot.lane.b32.xlu1 %v4258_v37, %s3892_s21 }
 0x32c   :  { %3808 = vrot.lane.b32.xlu0 %v3807_v41, %s3891_s12 }
 0x32d   :  { %3823 = vrot.lane.b32.xlu2 %v3802_v48, %s3892_s21 }
 0x332   :  { %2283 = vrot.lane.b32.xlu1 %v4252_v29, %s3893_s0 }
 0x334   :  { %3813 = vrot.lane.b32.xlu0 %v3832_v43, %s3891_s12 }
 0x335   :  { %3833 = vrot.lane.b32.xlu2 %v3832_v43, %s3893_s0 }
 0x33a   :  { %3848 = vrot.lane.b32.xlu1 %v3847_v46, %s3894_s22 }
 0x33c   :  { %1917 = vrot.lane.b32.xlu0 %v4252_v29, %s3891_s12 }
 0x33d   :  { %3843 = vrot.lane.b32.xlu2 %v3842_v50, %s3894_s22 }
 0x342   :  { %2811 = vrot.lane.b32.xlu1 %v4258_v37, %s3895_s23 }
 0x344   :  { %1925 = vrot.lane.b32.xlu0 %v4264_v39, %s3891_s12 }
 0x345   :  { %3853 = vrot.lane.b32.xlu2 %v3852_v51, %s3895_s23 }
 0x34a   :  { %2813 = vrot.lane.b32.xlu1 %v4261_v38, %s3895_s23 }
 0x34c   :  { %3828 = vrot.lane.b32.xlu0 %v3807_v41, %s3893_s0 }
 0x34d   :  { %3858 = vrot.lane.b32.xlu2 %v3857_v34, %s3895_s23 }
 0x352   :  { %2991 = vrot.lane.b32.xlu1 %v4255_v30, %s3896_s24 }
 0x354   :  { %3838 = vrot.lane.b32.xlu0 %v3857_v34, %s3893_s0 }
 0x355   :  { %3868 = vrot.lane.b32.xlu2 %v3847_v46, %s3896_s24 }
 0x35a   :  { %2999 = vrot.lane.b32.xlu1 %v4306_v52, %s3896_s24 }
 0x35c   :  { %2627 = vrot.lane.b32.xlu0 %v4255_v30, %s3894_s22 }
 0x35d   :  { %3175 = vrot.lane.b32.xlu2 %v4258_v37, %s3897_s25 }
 0x364   :  { %2635 = vrot.lane.b32.xlu0 %v4306_v52, %s3894_s22 }
 0x365   :  { %3177 = vrot.lane.b32.xlu2 %v4261_v38, %s3897_s25 }
 0x36c   :  { %3863 = vrot.lane.b32.xlu0 %v3842_v50, %s3896_s24  ;;  %v3688_v50 = vld [vmem:[%s4755_s5 + $0x20] sm:$0xff] }
 0x374   :  { %3873 = vrot.lane.b32.xlu0 %v3852_v51, %s3897_s25 }
 0x377   :  { %v3804_v44 = vpop.permute.xlu2 %3803 }
 0x378   :  { %v3805_v47 = vunpack.i.l.bf16 %v3804_v44  ;;  %v3806_v56 = vunpack.i.h.bf16 %v3804_v44 }
 0x37a   :  { %v1764_v35 = vsel %vm79_vm0, %v3805_v47, %v3806_v56 }
 0x37c   :  { %3878 = vrot.lane.b32.xlu0 %v3857_v34, %s3897_s25 }
 0x37f   :  { %v3819_v62 = vpop.permute.xlu2 %3818 }
 0x380   :  { %v3821_v0 = vunpack.i.h.bf16 %v3819_v62  ;;  %v3820_v2 = vunpack.i.l.bf16 %v3819_v62 }
 0x382   :  { %v2097_v12 = vsel %vm417_vm4, %v3820_v2, %v3821_v0 }
 0x387   :  { %v3824_v8 = vpop.permute.xlu2 %3823 }
 0x388   :  { %v3826_v9 = vunpack.i.h.bf16 %v3824_v8  ;;  %v3825_v11 = vunpack.i.l.bf16 %v3824_v8  ;;  %v3730_v8 = vld [vmem:[%s4755_s5 + $0x50] sm:$0xff] }
 0x38a   :  { %v2101_v22 = vsel %vm417_vm4, %v3825_v11, %v3826_v9 }
 0x38c   :  { %v1755_v53 = vpop.permute.xlu1 %1754 }
 0x38d   :  { %v1763_v42 = vsel %vm79_vm0, %v1755_v53, %v3805_v47 }
 0x38e   :  { %1861 = vmatpush.msra.mxu1 %v1763_v42  ;;  %v3799_v54 = vpop.permute.xlu0 %3798 }
 0x38f   :  { %v3801_v57 = vunpack.i.h.bf16 %v3799_v54  ;;  %v3800_v31 = vunpack.i.l.bf16 %v3799_v54  ;;  %3670 = vmatmul.msk.f32.vlgmr.msra.gmra.mxu1 %vm37_vm10, %v3662_v55  ;;  %v3834_v40 = vpop.permute.xlu2 %3833 }
 0x390   :  { %v3836_v41 = vunpack.i.h.bf16 %v3834_v40  ;;  %v3835_v47 = vunpack.i.l.bf16 %v3834_v40 }
 0x391   :  { %v1760_v32 = vsel %vm79_vm0, %v3800_v31, %v3801_v57 }
 0x392   :  { %1792 = vmatpush.msrb.mxu2 %v1760_v32  ;;  %v3702_v32 = vld [vmem:[%s4755_s5 + $0x30] sm:$0xff] }
 0x393   :  { %3664 = vmatmul.msk.f32.vlgmr.msrb.gmra.mxu2 %vm37_vm10, %v3662_v55 }
 0x394   :  { %1884 = vmatpush.msra.mxu2 %v1764_v35  ;;  %v2090_v13 = vpop.permute.xlu1 %2089 }
 0x395   :  { %v2098_v16 = vsel %vm417_vm4, %v3821_v0, %v2090_v13 }
 0x396   :  { %v1753_v58 = vpop.permute.xlu0 %1752 }
 0x397   :  { %v1761_v60 = vsel %vm79_vm0, %v3801_v57, %v1753_v58  ;;  %v1762_v36 = vsel %vm79_vm0, %v1753_v58, %v1755_v53  ;;  %3671 = vmatmul.msk.f32.gmra.mxu1 %vm37_vm10, %v3663_v59  ;;  %v3689_v53 = vld [vmem:[%s4755_s5 + $0x28] sm:$0xff] }
 0x398   :  { %1815 = vmatpush.msrb.mxu3 %v1761_v60  ;;  %1838 = vmatpush.msra.mxu0 %v1762_v36 }
 0x399   :  { %3666 = vmatmul.msk.f32.vlgmr.msrb.gmra.mxu3 %vm37_vm10, %v3662_v55  ;;  %3668 = vmatmul.msk.f32.vlgmr.msra.gmra.mxu0 %vm37_vm10, %v3662_v55 }
 0x39a   :  { %1907 = vmatpush.msra.mxu3 %v3806_v56 }
 0x39b   :  { %3665 = vmatmul.msk.f32.gmra.mxu2 %vm37_vm10, %v3663_v59 }
 0x39c   :  { %v2092_v23 = vpop.permute.xlu1 %2091 }
 0x39d   :  { %v2100_v26 = vsel %vm417_vm4, %v2092_v23, %v3825_v11  ;;  %v2099_v28 = vsel %vm417_vm4, %v2090_v13, %v2092_v23 }
 0x39e   :  { %v3809_v63 = vpop.permute.xlu0 %3808 }
 0x39f   :  { %v3811_v5 = vunpack.i.h.bf16 %v3809_v63  ;;  %v3810_v7 = vunpack.i.l.bf16 %v3809_v63  ;;  %v3717_v63 = vld [vmem:[%s4755_s5 + $0x48] sm:$0xff] }
 0x3a1   :  { %3667 = vmatmul.msk.f32.gmra.mxu3 %vm37_vm10, %v3663_v59  ;;  %v1929_v10 = vsel %vm245_vm3, %v3810_v7, %v3811_v5  ;;  %3669 = vmatmul.msk.f32.gmra.mxu0 %vm37_vm10, %v3663_v59 }
 0x3a2   :  { %2005 = vmatpush.msrb.mxu2 %v1929_v10 }
 0x3a3   :  { %3672 = vmatmul.msk.f32.vlgmr.msra.gmra.mxu2 %vm37_vm10, %v3662_v55 }
 0x3a4   :  { %2129 = vmatpush.msra.mxu2 %v2097_v12  ;;  %v2284_v45 = vpop.permute.xlu1 %2283 }
 0x3a5   :  { %v2295_v51 = vsel %vm602_vm5, %v3836_v41, %v2284_v45  ;;  %v3744_v41 = vld [vmem:[%s4755_s5 + $0x60] sm:$0xff] }
 0x3a6   :  { %v3814_v6 = vpop.permute.xlu0 %3813 }
 0x3a7   :  { %v3815_v14 = vunpack.i.l.bf16 %v3814_v6  ;;  %v3816_v17 = vunpack.i.h.bf16 %v3814_v6 }
 0x3a9   :  { %3674 = vmatmul.msk.f32.vlgmr.msra.gmra.mxu3 %vm37_vm10, %v3662_v55  ;;  %v1930_v15 = vsel %vm245_vm3, %v3811_v5, %v3815_v14 }
 0x3aa   :  { %2028 = vmatpush.msrb.mxu3 %v1930_v15 }
 0x3ab   :  { %3673 = vmatmul.msk.f32.gmra.mxu2 %vm37_vm10, %v3663_v59 }
 0x3ac   :  { %2152 = vmatpush.msra.mxu3 %v2098_v16 }
 0x3ae   :  { %v1918_v18 = vpop.permute.xlu0 %1917 }
 0x3af   :  { %v1927_v20 = vsel %vm245_vm3, %v3816_v17, %v1918_v18  ;;  %v1928_v21 = vsel %vm245_vm3, %v1918_v18, %v3810_v7 }
 0x3b0   :  { %1959 = vmatpush.msrb.mxu0 %v1927_v20  ;;  %1982 = vmatpush.msrb.mxu1 %v1928_v21  ;;  %v3731_v21 = vld [vmem:[%s4755_s5 + $0x58] sm:$0xff] }
 0x3b1   :  { %3675 = vmatmul.msk.f32.gmra.mxu3 %vm37_vm10, %v3663_v59  ;;  %3676 = vmatmul.msk.f32.vlgmr.msrb.gmra.mxu0 %vm37_vm10, %v1737_v19  ;;  %v3716_v59 = vld [vmem:[%s4755_s5 + $0x40] sm:$0xff] }
 0x3b2   :  { %3678 = vmatmul.msk.f32.vlgmr.msrb.gmra.mxu1 %vm37_vm10, %v1737_v19 }
 0x3b3   :  { %3680 = vmatmul.msk.f32.vlgmr.msrb.gmra.mxu2 %vm37_vm10, %v1737_v19 }
 0x3b4   :  { %2221 = vmatpush.msrb.mxu2 %v2101_v22 }
 0x3b6   :  { %v1926_v24 = vpop.permute.xlu0 %1925 }
 0x3b7   :  { %v1931_v27 = vsel %vm245_vm3, %v3815_v14, %v1926_v24  ;;  %2074 = vmatpush.msra.mxu1 %v1926_v24 }
 0x3b8   :  { %2051 = vmatpush.msra.mxu0 %v1931_v27 }
 0x3b9   :  { %2198 = vmatpush.msrb.mxu1 %v2100_v26  ;;  %3677 = vmatmul.msk.f32.gmra.mxu0 %vm37_vm10, %v1738_v25 }
 0x3ba   :  { %3682 = vmatmul.msk.f32.vlgmr.msrb.gmra.mxu3 %vm37_vm10, %v1737_v19  ;;  %3679 = vmatmul.msk.f32.gmra.mxu1 %vm37_vm10, %v1738_v25 }
 0x3bb   :  { %2175 = vmatpush.msrb.mxu0 %v2099_v28  ;;  %2244 = vmatpush.msrb.mxu3 %v3826_v9 }
 0x3bc   :  { %3681 = vmatmul.msk.f32.gmra.mxu2 %vm37_vm10, %v1738_v25 }
 0x3be   :  { %v3829_v48 = vpop.permute.xlu0 %3828 }
 0x3bf   :  { %v3831_v43 = vunpack.i.h.bf16 %v3829_v48  ;;  %v3830_v46 = vunpack.i.l.bf16 %v3829_v48 }
 0x3c1   :  { %3684 = vmatmul.msk.f32.vlgmr.msra.gmra.mxu0 %vm37_vm10, %v1737_v19  ;;  %v2296_v34 = vsel %vm602_vm5, %v2284_v45, %v3830_v46  ;;  %v2297_v44 = vsel %vm602_vm5, %v3830_v46, %v3831_v43  ;;  %v2298_v42 = vsel %vm602_vm5, %v3831_v43, %v3835_v47 }
 0x3c2   :  { %3683 = vmatmul.msk.f32.gmra.mxu3 %vm37_vm10, %v1738_v25  ;;  %3686 = vmatmul.msk.f32.vlgmr.msra.gmra.mxu1 %vm37_vm10, %v1737_v19 }
 0x3c3   :  { %2328 = vmatpush.msra.mxu0 %v2295_v51  ;;  %2351 = vmatpush.msra.mxu1 %v2296_v34 }
 0x3c4   :  { %3690 = vmatmul.msk.f32.vlgmr.msra.gmra.mxu2 %vm37_vm10, %v3688_v50 }
 0x3c5   :  { %2374 = vmatpush.msra.mxu2 %v2297_v44 }
 0x3c6   :  { %v3839_v54 = vpop.permute.xlu0 %3838 }
 0x3c7   :  { %v3840_v55 = vunpack.i.l.bf16 %v3839_v54  ;;  %v3841_v56 = vunpack.i.h.bf16 %v3839_v54 }
 0x3c9   :  { %3685 = vmatmul.msk.f32.gmra.mxu0 %vm37_vm10, %v1738_v25  ;;  %v2299_v57 = vsel %vm602_vm5, %v3835_v47, %v3840_v55  ;;  %v2300_v31 = vsel %vm602_vm5, %v3840_v55, %v3841_v56 }
 0x3ca   :  { %3692 = vmatmul.msk.f32.vlgmr.msra.gmra.mxu3 %vm37_vm10, %v3688_v50  ;;  %3687 = vmatmul.msk.f32.gmra.mxu1 %vm37_vm10, %v1738_v25 }
 0x3cb   :  { %2397 = vmatpush.msra.mxu3 %v2298_v42  ;;  %v3745_v42 = vld [vmem:[%s4755_s5 + $0x68] sm:$0xff] }
 0x3cc   :  { %3691 = vmatmul.msk.f32.gmra.mxu2 %vm37_vm10, %v3689_v53 }
 0x3d1   :  { %3694 = vmatmul.msk.f32.vlgmr.msrb.gmra.mxu0 %vm37_vm10, %v3688_v50 }
 0x3d2   :  { %3693 = vmatmul.msk.f32.gmra.mxu3 %vm37_vm10, %v3689_v53  ;;  %3696 = vmatmul.msk.f32.vlgmr.msrb.gmra.mxu1 %vm37_vm10, %v3688_v50 }
 0x3d3   :  { %2420 = vmatpush.msrb.mxu0 %v2299_v57  ;;  %2443 = vmatpush.msrb.mxu1 %v2300_v31 }
 0x3d4   :  { %3698 = vmatmul.msk.f32.vlgmr.msrb.gmra.mxu2 %vm37_vm10, %v3688_v50 }
 0x3d5   :  { %2487 = vmatpush.msrb.mxu2 %v4252_v29  ;;  %v3703_v29 = vld [vmem:[%s4755_s5 + $0x38] sm:$0xff] }
 0x3d9   :  { %3695 = vmatmul.msk.f32.gmra.mxu0 %vm37_vm10, %v3689_v53 }
 0x3da   :  { %3700 = vmatmul.msk.f32.vlgmr.msrb.gmra.mxu3 %vm37_vm10, %v3688_v50  ;;  %3697 = vmatmul.msk.f32.gmra.mxu1 %vm37_vm10, %v3689_v53 }
 0x3db   :  { %2510 = vmatpush.msrb.mxu3 %v4255_v30  ;;  %v3844_v30 = vpop.permute.xlu2 %3843 }
 0x3dc   :  { %3699 = vmatmul.msk.f32.gmra.mxu2 %vm37_vm10, %v3689_v53  ;;  %v3846_v35 = vunpack.i.h.bf16 %v3844_v30  ;;  %v3845_v58 = vunpack.i.l.bf16 %v3844_v30 }
 0x3de   :  { %v2639_v36 = vsel %vm941_vm6, %v3845_v58, %v3846_v35 }
 0x3e1   :  { %3704 = vmatmul.msk.f32.vlgmr.msra.gmra.mxu0 %vm37_vm10, %v3702_v32 }
 0x3e2   :  { %3701 = vmatmul.msk.f32.gmra.mxu3 %vm37_vm10, %v3689_v53  ;;  %3706 = vmatmul.msk.f32.vlgmr.msra.gmra.mxu1 %vm37_vm10, %v3702_v32 }
 0x3e3   :  { %2533 = vmatpush.msra.mxu0 %v4258_v37  ;;  %2556 = vmatpush.msra.mxu1 %v4261_v38  ;;  %v3849_v37 = vpop.permute.xlu1 %3848  ;;  %v2628_v38 = vpop.permute.xlu0 %2627 }
 0x3e4   :  { %3708 = vmatmul.msk.f32.vlgmr.msra.gmra.mxu2 %vm37_vm10, %v3702_v32  ;;  %v3850_v62 = vunpack.i.l.bf16 %v3849_v37  ;;  %v3854_v2 = vpop.permute.xlu2 %3853 }
 0x3e5   :  { %2579 = vmatpush.msra.mxu2 %v4264_v39  ;;  %v3851_v39 = vunpack.i.h.bf16 %v3849_v37  ;;  %v3856_v7 = vunpack.i.h.bf16 %v3854_v2  ;;  %v3855_v10 = vunpack.i.l.bf16 %v3854_v2 }
 0x3e6   :  { %v2640_v0 = vsel %vm941_vm6, %v3846_v35, %v3850_v62 }
 0x3e7   :  { %v2637_v60 = vsel %vm941_vm6, %v3851_v39, %v2628_v38  ;;  %v2819_v6 = vsel %vm1119_vm7, %v3855_v10, %v3856_v7 }
 0x3e9   :  { %3705 = vmatmul.msk.f32.gmra.mxu0 %vm37_vm10, %v3703_v29 }
 0x3ea   :  { %3710 = vmatmul.msk.f32.vlgmr.msra.gmra.mxu3 %vm37_vm10, %v3702_v32  ;;  %3707 = vmatmul.msk.f32.gmra.mxu1 %vm37_vm10, %v3703_v29 }
 0x3eb   :  { %2602 = vmatpush.msra.mxu3 %v4306_v52  ;;  %v2638_v52 = vsel %vm941_vm6, %v2628_v38, %v3845_v58  ;;  %v2636_v5 = vpop.permute.xlu0 %2635  ;;  %v2812_v13 = vpop.permute.xlu1 %2811 }
 0x3ec   :  { %3709 = vmatmul.msk.f32.gmra.mxu2 %vm37_vm10, %v3703_v29  ;;  %v2641_v12 = vsel %vm941_vm6, %v3850_v62, %v2636_v5  ;;  %v2820_v14 = vsel %vm1119_vm7, %v3856_v7, %v2812_v13  ;;  %v3859_v15 = vpop.permute.xlu2 %3858 }
 0x3ed   :  { %v3861_v17 = vunpack.i.h.bf16 %v3859_v15  ;;  %v3860_v18 = vunpack.i.l.bf16 %v3859_v15 }
 0x3ef   :  { %v2823_v11 = vsel %vm1119_vm7, %v3860_v18, %v3861_v17 }
 0x3f1   :  { %3712 = vmatmul.msk.f32.vlgmr.msrb.gmra.mxu0 %vm37_vm10, %v3702_v32 }
 0x3f2   :  { %3711 = vmatmul.msk.f32.gmra.mxu3 %vm37_vm10, %v3703_v29  ;;  %3714 = vmatmul.msk.f32.vlgmr.msrb.gmra.mxu1 %vm37_vm10, %v3702_v32 }
 0x3f3   :  { %2669 = vmatpush.msrb.mxu0 %v2637_v60  ;;  %2692 = vmatpush.msrb.mxu1 %v2638_v52  ;;  %v2814_v16 = vpop.permute.xlu1 %2813  ;;  %v3864_v23 = vpop.permute.xlu0 %3863 }
 0x3f4   :  { %3718 = vmatmul.msk.f32.vlgmr.msrb.gmra.mxu2 %vm37_vm10, %v3716_v59  ;;  %v2821_v19 = vsel %vm1119_vm7, %v2812_v13, %v2814_v16  ;;  %v2822_v9 = vsel %vm1119_vm7, %v2814_v16, %v3860_v18  ;;  %v3869_v25 = vpop.permute.xlu2 %3868  ;;  %v3865_v28 = vunpack.i.l.bf16 %v3864_v23  ;;  %v3866_v48 = vunpack.i.h.bf16 %v3864_v23 }
 0x3f5   :  { %2715 = vmatpush.msrb.mxu2 %v2639_v36  ;;  %v3871_v45 = vunpack.i.h.bf16 %v3869_v25  ;;  %v3870_v53 = vunpack.i.l.bf16 %v3869_v25 }
 0x3f6   :  { %v3003_v50 = vsel %vm1297_vm8, %v3865_v28, %v3866_v48 }
 0x3f7   :  { %v3004_v54 = vsel %vm1297_vm8, %v3866_v48, %v3870_v53 }
 0x3f9   :  { %3713 = vmatmul.msk.f32.gmra.mxu0 %vm37_vm10, %v3703_v29 }
 0x3fa   :  { %3720 = vmatmul.msk.f32.vlgmr.msrb.gmra.mxu3 %vm37_vm10, %v3716_v59  ;;  %3715 = vmatmul.msk.f32.gmra.mxu1 %vm37_vm10, %v3703_v29 }
 0x3fb   :  { %2738 = vmatpush.msrb.mxu3 %v2640_v0  ;;  %v2992_v27 = vpop.permute.xlu1 %2991  ;;  %v3874_v55 = vpop.permute.xlu0 %3873 }
 0x3fc   :  { %3719 = vmatmul.msk.f32.gmra.mxu2 %vm37_vm10, %v3717_v63  ;;  %v3001_v43 = vsel %vm1297_vm8, %v3871_v45, %v2992_v27  ;;  %v3002_v46 = vsel %vm1297_vm8, %v2992_v27, %v3865_v28  ;;  %v3876_v29 = vunpack.i.h.bf16 %v3874_v55  ;;  %v3875_v30 = vunpack.i.l.bf16 %v3874_v55  ;;  %v3176_v39 = vpop.permute.xlu2 %3175 }
 0x3fe   :  { %v3184_v2 = vsel %vm1475_vm9, %v3876_v29, %v3176_v39 }
 0x401   :  { %3722 = vmatmul.msk.f32.vlgmr.msra.gmra.mxu0 %vm37_vm10, %v3716_v59 }
 0x402   :  { %3721 = vmatmul.msk.f32.gmra.mxu3 %vm37_vm10, %v3717_v63  ;;  %3724 = vmatmul.msk.f32.vlgmr.msra.gmra.mxu1 %vm37_vm10, %v3716_v59 }
 0x403   :  { %2761 = vmatpush.msra.mxu0 %v2641_v12  ;;  %2784 = vmatpush.msra.mxu1 %v2636_v5  ;;  %v3000_v57 = vpop.permute.xlu1 %2999  ;;  %v3879_v5 = vpop.permute.xlu0 %3878 }
 0x404   :  { %3726 = vmatmul.msk.f32.vlgmr.msra.gmra.mxu2 %vm37_vm10, %v3716_v59  ;;  %v3005_v58 = vsel %vm1297_vm8, %v3870_v53, %v3000_v57  ;;  %v3178_v10 = vpop.permute.xlu2 %3177  ;;  %v3880_v12 = vunpack.i.l.bf16 %v3879_v5  ;;  %v3881_v15 = vunpack.i.h.bf16 %v3879_v5 }
 0x405   :  { %2851 = vmatpush.msra.mxu2 %v2819_v6 }
 0x409   :  { %3723 = vmatmul.msk.f32.gmra.mxu0 %vm37_vm10, %v3717_v63 }
 0x40a   :  { %3728 = vmatmul.msk.f32.vlgmr.msra.gmra.mxu3 %vm37_vm10, %v3716_v59  ;;  %3725 = vmatmul.msk.f32.gmra.mxu1 %vm37_vm10, %v3717_v63  ;;  %v3183_v59 = vsel %vm1475_vm9, %v3875_v30, %v3876_v29  ;;  %v3773_v29 = vld [vmem:[%s4755_s5 + $0x88] sm:$0xff] }
 0x40b   :  { %2874 = vmatpush.msra.mxu3 %v2820_v14  ;;  %v3758_v14 = vld [vmem:[%s4755_s5 + $0x70] sm:$0xff] }
 0x40c   :  { %3727 = vmatmul.msk.f32.gmra.mxu2 %vm37_vm10, %v3717_v63  ;;  %v4473_v24 = vpop.f32.mrf.mxu1 }
 0x411   :  { %3732 = vmatmul.msk.f32.vlgmr.msrb.gmra.mxu0 %vm37_vm10, %v3730_v8 }
 0x412   :  { %3729 = vmatmul.msk.f32.gmra.mxu3 %vm37_vm10, %v3717_v63  ;;  %3734 = vmatmul.msk.f32.vlgmr.msrb.gmra.mxu1 %vm37_vm10, %v3730_v8 }
 0x413   :  { %2897 = vmatpush.msrb.mxu0 %v2821_v19  ;;  %2920 = vmatpush.msrb.mxu1 %v2822_v9  ;;  %v3185_v19 = vsel %vm1475_vm9, %v3176_v39, %v3178_v10  ;;  %v3186_v9 = vsel %vm1475_vm9, %v3178_v10, %v3880_v12 }
 0x414   :  { %3736 = vmatmul.msk.f32.vlgmr.msrb.gmra.mxu2 %vm37_vm10, %v3730_v8  ;;  %v4485_v44 = vpop.f32.mrf.mxu1 }
 0x415   :  { %2943 = vmatpush.msrb.mxu2 %v2823_v11  ;;  %v3187_v11 = vsel %vm1475_vm9, %v3880_v12, %v3881_v15 }
 0x416   :  { %v1794_v20 = vpop.f32.mrf.mxu2  ;;  %v4470_v22 = vpop.f32.mrf.mxu0 }
 0x419   :  { %3733 = vmatmul.msk.f32.gmra.mxu0 %vm37_vm10, %v3731_v21 }
 0x41a   :  { %3738 = vmatmul.msk.f32.vlgmr.msrb.gmra.mxu3 %vm37_vm10, %v3730_v8  ;;  %3735 = vmatmul.msk.f32.gmra.mxu1 %vm37_vm10, %v3731_v21 }
 0x41b   :  { %2966 = vmatpush.msrb.mxu3 %v3861_v17 }
 0x41c   :  { %3737 = vmatmul.msk.f32.gmra.mxu2 %vm37_vm10, %v3731_v21  ;;  %v1817_v26 = vpop.f32.mrf.mxu3 }
 0x41e   :  { %v1797_v40 = vpop.f32.mrf.mxu2  ;;  %v1843_v34 = vpop.f32.mrf.mxu0 }
 0x421   :  { %3740 = vmatmul.msk.f32.vlgmr.msra.gmra.mxu0 %vm37_vm10, %v3730_v8 }
 0x422   :  { %3739 = vmatmul.msk.f32.gmra.mxu3 %vm37_vm10, %v3731_v21  ;;  %3742 = vmatmul.msk.f32.vlgmr.msra.gmra.mxu1 %vm37_vm10, %v3730_v8 }
 0x423   :  { %3033 = vmatpush.msra.mxu0 %v3001_v43  ;;  %3056 = vmatpush.msra.mxu1 %v3002_v46 }
 0x424   :  { %3746 = vmatmul.msk.f32.vlgmr.msra.gmra.mxu2 %vm37_vm10, %v3744_v41  ;;  %v1820_v51 = vpop.f32.mrf.mxu3 }
 0x425   :  { %3079 = vmatpush.msra.mxu2 %v3003_v50 }
 0x426   :  { %v1886_v47 = vpop.f32.mrf.mxu2 }
 0x429   :  { %3741 = vmatmul.msk.f32.gmra.mxu0 %vm37_vm10, %v3731_v21 }
 0x42a   :  { %3748 = vmatmul.msk.f32.vlgmr.msra.gmra.mxu3 %vm37_vm10, %v3744_v41  ;;  %3743 = vmatmul.msk.f32.gmra.mxu1 %vm37_vm10, %v3731_v21 }
 0x42b   :  { %3102 = vmatpush.msra.mxu3 %v3004_v54 }
 0x42c   :  { %3747 = vmatmul.msk.f32.gmra.mxu2 %vm37_vm10, %v3745_v42  ;;  %v1909_v56 = vpop.f32.mrf.mxu3 }
 0x42e   :  { %v1889_v31 = vpop.f32.mrf.mxu2  ;;  %v1961_v32 = vpop.f32.mrf.mxu0 }
 0x42f   :  { %v1962_v37 = vadd.f32 %v1961_v32, %v1794_v20  ;;  %v1984_v38 = vpop.f32.mrf.mxu1 }
 0x430   :  { %v1985_v35 = vadd.f32 %v1984_v38, %v1817_v26  ;;  %v3759_v26 = vld [vmem:[%s4755_s5 + $0x78] sm:$0xff] }
 0x431   :  { %3750 = vmatmul.msk.f32.vlgmr.msrb.gmra.mxu0 %vm37_vm10, %v3744_v41 }
 0x432   :  { %3749 = vmatmul.msk.f32.gmra.mxu3 %vm37_vm10, %v3745_v42  ;;  %3752 = vmatmul.msk.f32.vlgmr.msrb.gmra.mxu1 %vm37_vm10, %v3744_v41 }
 0x433   :  { %3125 = vmatpush.msrb.mxu0 %v3005_v58  ;;  %3148 = vmatpush.msrb.mxu1 %v3000_v57 }
 0x434   :  { %3754 = vmatmul.msk.f32.vlgmr.msrb.gmra.mxu2 %vm37_vm10, %v3744_v41  ;;  %v1912_v60 = vpop.f32.mrf.mxu3 }
 0x435   :  { %3215 = vmatpush.msrb.mxu2 %v3183_v59 }
 0x436   :  { %v1964_v52 = vpop.f32.mrf.mxu0  ;;  %v2007_v36 = vpop.f32.mrf.mxu2 }
 0x437   :  { %v1965_v62 = vadd.f32 %v1964_v52, %v1797_v40  ;;  %v1987_v63 = vpop.f32.mrf.mxu1 }
 0x438   :  { %v1988_v0 = vadd.f32 %v1987_v63, %v1820_v51 }
 0x439   :  { %3751 = vmatmul.msk.f32.gmra.mxu0 %vm37_vm10, %v3745_v42 }
 0x43a   :  { %3756 = vmatmul.msk.f32.vlgmr.msrb.gmra.mxu3 %vm37_vm10, %v3744_v41  ;;  %3753 = vmatmul.msk.f32.gmra.mxu1 %vm37_vm10, %v3745_v42  ;;  %v2008_v41 = vadd.f32 %v2007_v36, %v4470_v22 }
 0x43b   :  { %3238 = vmatpush.msrb.mxu3 %v3184_v2 }
 0x43c   :  { %3755 = vmatmul.msk.f32.gmra.mxu2 %vm37_vm10, %v3745_v42 }
 0x43d   :  { %v2030_v7 = vpop.f32.mrf.mxu3 }
 0x43e   :  { %v2053_v13 = vpop.f32.mrf.mxu0  ;;  %v2031_v46 = vadd.f32 %v2030_v7, %v4473_v24 }
 0x43f   :  { %v2010_v6 = vpop.f32.mrf.mxu2  ;;  %v2054_v8 = vadd.f32 %v2053_v13, %v1886_v47  ;;  %v2076_v17 = vpop.f32.mrf.mxu1 }
 0x440   :  { %v2011_v16 = vadd.f32 %v2010_v6, %v1843_v34  ;;  %v2077_v18 = vadd.f32 %v2076_v17, %v1909_v56 }
 0x441   :  { %3760 = vmatmul.msk.f32.vlgmr.msra.gmra.mxu0 %vm37_vm10, %v3758_v14 }
 0x442   :  { %3757 = vmatmul.msk.f32.gmra.mxu3 %vm37_vm10, %v3745_v42  ;;  %3762 = vmatmul.msk.f32.vlgmr.msra.gmra.mxu1 %vm37_vm10, %v3758_v14  ;;  %v3772_v42 = vld [vmem:[%s4755_s5 + $0x80] sm:$0xff] }
 0x443   :  { %3261 = vmatpush.msra.mxu0 %v3185_v19  ;;  %3284 = vmatpush.msra.mxu1 %v3186_v9 }
 0x444   :  { %3764 = vmatmul.msk.f32.vlgmr.msra.gmra.mxu2 %vm37_vm10, %v3758_v14 }
 0x445   :  { %3307 = vmatpush.msra.mxu2 %v3187_v11  ;;  %v2033_v20 = vpop.f32.mrf.mxu3 }
 0x446   :  { %v2034_v21 = vadd.f32 %v2033_v20, %v4485_v44  ;;  %v2056_v23 = vpop.f32.mrf.mxu0 }
 0x447   :  { %v2131_v25 = vpop.f32.mrf.mxu2  ;;  %v2057_v27 = vadd.f32 %v2056_v23, %v1889_v31  ;;  %v2079_v28 = vpop.f32.mrf.mxu1 }
 0x448   :  { %v2252_v40 = vadd.f32 %v2131_v25, %v1962_v37  ;;  %v2080_v45 = vadd.f32 %v2079_v28, %v1912_v60 }
 0x449   :  { %3761 = vmatmul.msk.f32.gmra.mxu0 %vm37_vm10, %v3759_v26 }
 0x44a   :  { %3766 = vmatmul.msk.f32.vlgmr.msra.gmra.mxu3 %vm37_vm10, %v3758_v14  ;;  %3763 = vmatmul.msk.f32.gmra.mxu1 %vm37_vm10, %v3759_v26 }
 0x44b   :  { %3330 = vmatpush.msra.mxu3 %v3881_v15 }
 0x44c   :  { %3765 = vmatmul.msk.f32.gmra.mxu2 %vm37_vm10, %v3759_v26 }
 0x44d   :  { %v2154_v48 = vpop.f32.mrf.mxu3 }
 0x44e   :  { %v2253_v43 = vadd.f32 %v2154_v48, %v1985_v35  ;;  %v2177_v51 = vpop.f32.mrf.mxu0 }
 0x44f   :  { %v2134_v50 = vpop.f32.mrf.mxu2  ;;  %v2254_v44 = vadd.f32 %v2177_v51, %v2008_v41  ;;  %v2200_v47 = vpop.f32.mrf.mxu1 }
 0x450   :  { %v2258_v34 = vadd.f32 %v2134_v50, %v1965_v62  ;;  %v2255_v53 = vadd.f32 %v2200_v47, %v2031_v46 }
 0x451   :  { %3768 = vmatmul.msk.f32.vlgmr.msrb.gmra.mxu0 %vm37_vm10, %v3758_v14 }
 0x452   :  { %3767 = vmatmul.msk.f32.gmra.mxu3 %vm37_vm10, %v3759_v26  ;;  %3770 = vmatmul.msk.f32.vlgmr.msrb.gmra.mxu1 %vm37_vm10, %v3758_v14 }
 0x454   :  { %3774 = vmatmul.msk.f32.vlgmr.msrb.gmra.mxu2 %vm37_vm10, %v3772_v42 }
 0x455   :  { %v2157_v22 = vpop.f32.mrf.mxu3 }
 0x456   :  { %v2259_v24 = vadd.f32 %v2157_v22, %v1988_v0  ;;  %v2180_v54 = vpop.f32.mrf.mxu0 }
 0x457   :  { %v2223_v55 = vpop.f32.mrf.mxu2  ;;  %v2260_v56 = vadd.f32 %v2180_v54, %v2011_v16  ;;  %v2203_v57 = vpop.f32.mrf.mxu1 }
 0x458   :  { %v2256_v31 = vadd.f32 %v2223_v55, %v2054_v8  ;;  %v2261_v32 = vadd.f32 %v2203_v57, %v2034_v21 }
 0x459   :  { %3769 = vmatmul.msk.f32.gmra.mxu0 %vm37_vm10, %v3759_v26 }
 0x45a   :  { %3776 = vmatmul.msk.f32.vlgmr.msrb.gmra.mxu3 %vm37_vm10, %v3772_v42  ;;  %3771 = vmatmul.msk.f32.gmra.mxu1 %vm37_vm10, %v3759_v26 }
 0x45c   :  { %3775 = vmatmul.msk.f32.gmra.mxu2 %vm37_vm10, %v3773_v29 }
 0x45d   :  { %v2246_v30 = vpop.f32.mrf.mxu3 }
 0x45e   :  { %v2257_v37 = vadd.f32 %v2246_v30, %v2077_v18  ;;  %v2330_v35 = vpop.f32.mrf.mxu0 }
 0x45f   :  { %v2226_v38 = vpop.f32.mrf.mxu2  ;;  %v2451_v39 = vadd.f32 %v2330_v35, %v2252_v40  ;;  %v2353_v59 = vpop.f32.mrf.mxu1 }
 0x460   :  { %v2262_v58 = vadd.f32 %v2226_v38, %v2057_v27  ;;  %v2452_v60 = vadd.f32 %v2353_v59, %v2253_v43 }
 0x461   :  { %3778 = vmatmul.msk.f32.vlgmr.msra.gmra.mxu0 %vm37_vm10, %v3772_v42 }
 0x462   :  { %3777 = vmatmul.msk.f32.gmra.mxu3 %vm37_vm10, %v3773_v29  ;;  %3780 = vmatmul.msk.f32.vlgmr.msra.gmra.mxu1 %vm37_vm10, %v3772_v42 }
 0x464   :  { %3782 = vmatmul.msk.f32.vlgmr.msra.gmra.mxu2 %vm37_vm10, %v3772_v42 }
 0x465   :  { %v2249_v52 = vpop.f32.mrf.mxu3 }
 0x466   :  { %v2263_v36 = vadd.f32 %v2249_v52, %v2080_v45  ;;  %v2333_v62 = vpop.f32.mrf.mxu0 }
 0x467   :  { %v2376_v63 = vpop.f32.mrf.mxu2  ;;  %v2457_v0 = vadd.f32 %v2333_v62, %v2258_v34  ;;  %v2356_v2 = vpop.f32.mrf.mxu1 }
 0x468   :  { %v2453_v5 = vadd.f32 %v2376_v63, %v2254_v44  ;;  %v2458_v7 = vadd.f32 %v2356_v2, %v2259_v24 }
 0x469   :  { %3779 = vmatmul.msk.f32.gmra.mxu0 %vm37_vm10, %v3773_v29 }
 0x46a   :  { %3784 = vmatmul.msk.f32.vlgmr.msra.gmra.mxu3 %vm37_vm10, %v3772_v42  ;;  %3781 = vmatmul.msk.f32.gmra.mxu1 %vm37_vm10, %v3773_v29 }
 0x46c   :  { %3783 = vmatmul.msk.f32.gmra.mxu2 %vm37_vm10, %v3773_v29 }
 0x46d   :  { %v2399_v10 = vpop.f32.mrf.mxu3 }
 0x46e   :  { %v2454_v12 = vadd.f32 %v2399_v10, %v2255_v53  ;;  %v2422_v13 = vpop.f32.mrf.mxu0 }
 0x46f   :  { %v2379_v6 = vpop.f32.mrf.mxu2  ;;  %v2455_v15 = vadd.f32 %v2422_v13, %v2256_v31  ;;  %v2445_v16 = vpop.f32.mrf.mxu1 }
 0x470   :  { %v2459_v14 = vadd.f32 %v2379_v6, %v2260_v56  ;;  %v2456_v8 = vadd.f32 %v2445_v16, %v2257_v37 }
 0x472   :  { %3785 = vmatmul.msk.f32.gmra.mxu3 %vm37_vm10, %v3773_v29 }
 0x475   :  { %v2402_v17 = vpop.f32.mrf.mxu3 }
 0x476   :  { %v2460_v18 = vadd.f32 %v2402_v17, %v2261_v32  ;;  %v2425_v19 = vpop.f32.mrf.mxu0 }
 0x477   :  { %v2489_v9 = vpop.f32.mrf.mxu2  ;;  %v2461_v11 = vadd.f32 %v2425_v19, %v2262_v58  ;;  %v2448_v20 = vpop.f32.mrf.mxu1 }
 0x478   :  { %v2610_v21 = vadd.f32 %v2489_v9, %v2451_v39  ;;  %v2462_v23 = vadd.f32 %v2448_v20, %v2263_v36 }
 0x47d   :  { %v2512_v25 = vpop.f32.mrf.mxu3 }
 0x47e   :  { %v2611_v26 = vadd.f32 %v2512_v25, %v2452_v60  ;;  %v2535_v28 = vpop.f32.mrf.mxu0 }
 0x47f   :  { %v2492_v27 = vpop.f32.mrf.mxu2  ;;  %v2612_v45 = vadd.f32 %v2535_v28, %v2453_v5  ;;  %v2558_v48 = vpop.f32.mrf.mxu1 }
 0x480   :  { %v2616_v40 = vadd.f32 %v2492_v27, %v2457_v0  ;;  %v2613_v41 = vadd.f32 %v2558_v48, %v2454_v12 }
 0x485   :  { %v2515_v43 = vpop.f32.mrf.mxu3 }
 0x486   :  { %v2617_v46 = vadd.f32 %v2515_v43, %v2458_v7  ;;  %v2538_v50 = vpop.f32.mrf.mxu0 }
 0x487   :  { %v2581_v51 = vpop.f32.mrf.mxu2  ;;  %v2618_v34 = vadd.f32 %v2538_v50, %v2459_v14  ;;  %v2561_v44 = vpop.f32.mrf.mxu1 }
 0x488   :  { %v4549_v47 = vadd.f32 %v2581_v51, %v2455_v15  ;;  %v2619_v53 = vadd.f32 %v2561_v44, %v2460_v18 }
 0x48d   :  { %v2604_v42 = vpop.f32.mrf.mxu3 }
 0x48e   :  { %v4551_v22 = vadd.f32 %v2604_v42, %v2456_v8  ;;  %v2671_v54 = vpop.f32.mrf.mxu0 }
 0x48f   :  { %v2584_v24 = vpop.f32.mrf.mxu2  ;;  %v2792_v56 = vadd.f32 %v2671_v54, %v2610_v21  ;;  %v2694_v57 = vpop.f32.mrf.mxu1 }
 0x490   :  { %v4553_v55 = vadd.f32 %v2584_v24, %v2461_v11  ;;  %v2793_v31 = vadd.f32 %v2694_v57, %v2611_v26 }
 0x495   :  { %v2607_v32 = vpop.f32.mrf.mxu3 }
 0x496   :  { %v4555_v29 = vadd.f32 %v2607_v32, %v2462_v23  ;;  %v2674_v30 = vpop.f32.mrf.mxu0 }
 0x497   :  { %v2717_v37 = vpop.f32.mrf.mxu2  ;;  %v2798_v38 = vadd.f32 %v2674_v30, %v2616_v40  ;;  %v2697_v35 = vpop.f32.mrf.mxu1 }
 0x498   :  { %v2794_v58 = vadd.f32 %v2717_v37, %v2612_v45  ;;  %v2799_v39 = vadd.f32 %v2697_v35, %v2617_v46 }
 0x49d   :  { %v2740_v59 = vpop.f32.mrf.mxu3 }
 0x49e   :  { %v2795_v60 = vadd.f32 %v2740_v59, %v2613_v41  ;;  %v2763_v36 = vpop.f32.mrf.mxu0 }
 0x49f   :  { %v2720_v52 = vpop.f32.mrf.mxu2  ;;  %v2786_v63 = vpop.f32.mrf.mxu1  ;;  %v2796_v30 = vadd.f32 %v2763_v36, %v4549_v47 }
 0x4a0   :  { %v2800_v62 = vadd.f32 %v2720_v52, %v2618_v34 }
 0x4a5   :  { %v2743_v0 = vpop.f32.mrf.mxu3 }
 0x4a6   :  { %v4557_v2 = vadd.f32 %v2743_v0, %v2619_v53  ;;  %v4559_v5 = vpop.f32.mrf.mxu0 }
 0x4a7   :  { %v2853_v7 = vpop.f32.mrf.mxu2  ;;  %v4561_v10 = vpop.f32.mrf.mxu1 }
 0x4a8   :  { %v2974_v50 = vadd.f32 %v2853_v7, %v2792_v56 }
 0x4ad   :  { %v2876_v12 = vpop.f32.mrf.mxu3 }
 0x4ae   :  { %v2899_v13 = vpop.f32.mrf.mxu0  ;;  %v2975_v46 = vadd.f32 %v2876_v12, %v2793_v31 }
 0x4af   :  { %v2856_v6 = vpop.f32.mrf.mxu2  ;;  %v2922_v14 = vpop.f32.mrf.mxu1  ;;  %v2976_v44 = vadd.f32 %v2899_v13, %v2794_v58 }
 0x4b0   :  { %v2980_v56 = vadd.f32 %v2856_v6, %v2798_v38  ;;  %v2977_v31 = vadd.f32 %v2922_v14, %v2795_v60  ;;  %v2797_v38 = vadd.f32 %v2786_v63, %v4551_v22 }
 0x4b5   :  { %v2879_v15 = vpop.f32.mrf.mxu3 }
 0x4b6   :  { %v2902_v16 = vpop.f32.mrf.mxu0  ;;  %v2981_v37 = vadd.f32 %v2879_v15, %v2799_v39 }
 0x4b7   :  { %v2945_v8 = vpop.f32.mrf.mxu2  ;;  %v2925_v17 = vpop.f32.mrf.mxu1  ;;  %v2982_v13 = vadd.f32 %v2902_v16, %v2800_v62  ;;  %v2802_v62 = vadd.f32 %v4559_v5, %v4553_v55 }
 0x4b8   :  { %v2978_v58 = vadd.f32 %v2945_v8, %v2796_v30 }
 0x4bd   :  { %v2968_v18 = vpop.f32.mrf.mxu3 }
 0x4be   :  { %v3035_v9 = vpop.f32.mrf.mxu0 }
 0x4bf   :  { %v2948_v19 = vpop.f32.mrf.mxu2  ;;  %v3058_v11 = vpop.f32.mrf.mxu1  ;;  %v3156_v53 = vadd.f32 %v3035_v9, %v2974_v50 }
 0x4c0   :  { %v3157_v51 = vadd.f32 %v3058_v11, %v2975_v46  ;;  %v2984_v22 = vadd.f32 %v2948_v19, %v2802_v62 }
 0x4c5   :  { %v4563_v20 = vpop.f32.mrf.mxu3 }
 0x4c6   :  { %v3038_v21 = vpop.f32.mrf.mxu0 }
 0x4c7   :  { %v3081_v23 = vpop.f32.mrf.mxu2  ;;  %v3061_v25 = vpop.f32.mrf.mxu1  ;;  %v3162_v9 = vadd.f32 %v3038_v21, %v2980_v56 }
 0x4c8   :  { %v3158_v57 = vadd.f32 %v3081_v23, %v2976_v44  ;;  %v3163_v0 = vadd.f32 %v3061_v25, %v2981_v37 }
 0x4cd   :  { %v3104_v26 = vpop.f32.mrf.mxu3 }
 0x4ce   :  { %v3127_v28 = vpop.f32.mrf.mxu0  ;;  %v3159_v11 = vadd.f32 %v3104_v26, %v2977_v31 }
 0x4cf   :  { %v3084_v27 = vpop.f32.mrf.mxu2  ;;  %v3150_v40 = vpop.f32.mrf.mxu1  ;;  %v3160_v23 = vadd.f32 %v3127_v28, %v2978_v58  ;;  %v2983_v28 = vadd.f32 %v2925_v17, %v4557_v2  ;;  %v2803_v17 = vadd.f32 %v4561_v10, %v4555_v29 }
 0x4d0   :  { %v3164_v6 = vadd.f32 %v3084_v27, %v2982_v13 }
 0x4d1   :  { %v2985_v30 = vadd.f32 %v4563_v20, %v2803_v17 }
 0x4d5   :  { %v3107_v45 = vpop.f32.mrf.mxu3 }
 0x4d6   :  { %v3130_v48 = vpop.f32.mrf.mxu0 }
 0x4d7   :  { %v3217_v41 = vpop.f32.mrf.mxu2  ;;  %v4565_v43 = vpop.f32.mrf.mxu1 }
 0x4d8   :  { %v4569_v32 = vadd.f32 %v3217_v41, %v3156_v53  ;;  %v2979_v41 = vadd.f32 %v2968_v18, %v2797_v38 }
 0x4da   :  { %v3350_v7 = vmul.f32 %v4569_v32, %v4219_v49  ;;  %v3161_v46 = vadd.f32 %v3150_v40, %v2979_v41 }
 0x4dd   :  { %v3240_v34 = vpop.f32.mrf.mxu3 }
 0x4de   :  { %v4567_v42 = vadd.f32 %v3240_v34, %v3157_v51  ;;  %v3263_v54 = vpop.f32.mrf.mxu0  ;;  %v3165_v51 = vadd.f32 %v3107_v45, %v2983_v28  ;;  %v3166_v34 = vadd.f32 %v3130_v48, %v2984_v22 }
 0x4df   :  { %v3220_v24 = vpop.f32.mrf.mxu2  ;;  %v4574_v59 = vadd.f32 %v3263_v54, %v3158_v57  ;;  %v3286_v52 = vpop.f32.mrf.mxu1 }
 0x4e0   :  { %v3351_v35 = vmul.f32 %v4567_v42, %v4221_v33  ;;  %v4583_v14 = vadd.f32 %v3220_v24, %v3162_v9  ;;  %v3341_v8 = vadd.f32 %v3286_v52, %v3159_v11 }
 0x4e1   :  { %v3352_v39 = vmul.f32 %v4574_v59, %v4225_v4 }
 0x4e2   :  { %v3362_v47 = vadd.f32 %v3351_v35, %v3350_v7  ;;  %v3356_v63 = vmul.f32 %v4583_v14, %v4219_v49  ;;  %v3353_v27 = vmul.f32 %v3341_v8, %v4227_v61  ;;  %v3167_v35 = vadd.f32 %v4565_v43, %v2985_v30 }
 0x4e4   :  { %v3363_v16 = vadd.f32 %v3362_v47, %v3352_v39 }
 0x4e5   :  { %v3243_v12 = vpop.f32.mrf.mxu3 }
 0x4e6   :  { %v4580_v36 = vadd.f32 %v3243_v12, %v3163_v0  ;;  %v3266_v60 = vpop.f32.mrf.mxu0  ;;  %v3364_v44 = vadd.f32 %v3363_v16, %v3353_v27 }
 0x4e7   :  { %v3309_v15 = vpop.f32.mrf.mxu2  ;;  %v4589_v26 = vadd.f32 %v3266_v60, %v3164_v6  ;;  %v3289_v55 = vpop.f32.mrf.mxu1 }
 0x4e8   :  { %v3342_v25 = vadd.f32 %v3309_v15, %v3160_v23  ;;  %v3357_v21 = vmul.f32 %v4580_v36, %v4221_v33  ;;  %v3347_v40 = vadd.f32 %v3289_v55, %v3165_v51 }
 0x4e9   :  { %v3358_v24 = vmul.f32 %v4589_v26, %v4225_v4 }
 0x4ea   :  { %v3354_v18 = vmul.f32 %v3342_v25, %v4229_v1  ;;  %v3370_v53 = vadd.f32 %v3357_v21, %v3356_v63  ;;  %v3359_v56 = vmul.f32 %v3347_v40, %v4227_v61 }
 0x4ec   :  { %v3365_v57 = vadd.f32 %v3364_v44, %v3354_v18  ;;  %v3371_v37 = vadd.f32 %v3370_v53, %v3358_v24 }
 0x4ed   :  { %v3332_v50 = vpop.f32.mrf.mxu3 }
 0x4ee   :  { %v3343_v5 = vadd.f32 %v3332_v50, %v3161_v46  ;;  %v3372_v10 = vadd.f32 %v3371_v37, %v3359_v56 }
 0x4ef   :  { %v3312_v2 = vpop.f32.mrf.mxu2 }
 0x4f0   :  { %v3355_v19 = vmul.f32 %v3343_v5, %v4231_v3  ;;  %v3348_v54 = vadd.f32 %v3312_v2, %v3166_v34 }
 0x4f2   :  { %v3366_v45 = vsel %vm37_vm10, %v3355_v19, 0.0  ;;  %v3360_v31 = vmul.f32 %v3348_v54, %v4229_v1 }
 0x4f3   :  { %v3367_v48 = vadd.f32 %v3366_v45, %v3365_v57 }
 0x4f4   :  { %v3373_v0 = vadd.f32 %v3372_v10, %v3360_v31 }
 0x4f5   :  { %v3335_v52 = vpop.f32.mrf.mxu3  ;;  %3368 = vadd.xlane.f32.xlu1 %v3367_v48 }
 0x4f6   :  { %v3349_v29 = vadd.f32 %v3335_v52, %v3167_v35 }
 0x4f8   :  { %v3361_v58 = vmul.f32 %v3349_v29, %v4231_v3 }
 0x4fa   :  { %v3374_v7 = vsel %vm37_vm10, %v3361_v58, 0.0 }
 0x4fb   :  { %v3375_v20 = vadd.f32 %v3374_v7, %v3373_v0 }
 0x4fd   :  { %3376 = vadd.xlane.f32.xlu0 %v3375_v20 }
 0x568   :  { %v3369_v12 = vpop.xlane.xlu1 %3368 }
 0x569   :  { %v3378_v13 = vmul.f32 0.001953125, %v3369_v12 }
 0x56b   :  { %v3380_v9 = vsub.f32 %v4569_v32, %v3378_v13  ;;  %v3381_v43 = vsub.f32 %v4567_v42, %v3378_v13  ;;  %v3382_v11 = vsub.f32 %v4574_v59, %v3378_v13  ;;  %v3383_v23 = vsub.f32 %v3341_v8, %v3378_v13 }
 0x56c   :  { %v3384_v47 = vsub.f32 %v3342_v25, %v3378_v13  ;;  %v3385_v39 = vsub.f32 %v3343_v5, %v3378_v13 }
 0x56d   :  { %v4612_v15 = vmul.f32 %v3380_v9, %v4219_v49  ;;  %v4615_v38 = vmul.f32 %v3381_v43, %v4221_v33  ;;  %v4618_v60 = vmul.f32 %v3382_v11, %v4225_v4  ;;  %v4621_v6 = vmul.f32 %v3383_v23, %v4227_v61 }
 0x56e   :  { %v4624_v32 = vmul.f32 %v3384_v47, %v4229_v1  ;;  %v4631_v25 = vmul.f32 %v3385_v39, %v4231_v3 }
 0x56f   :  { %v3404_v42 = vmul.f32 %v4612_v15, %v4612_v15  ;;  %v3405_v59 = vmul.f32 %v4615_v38, %v4615_v38  ;;  %v3406_v62 = vmul.f32 %v4618_v60, %v4618_v60  ;;  %v3407_v21 = vmul.f32 %v4621_v6, %v4621_v6 }
 0x570   :  { %v3377_v8 = vpop.xlane.xlu0 %3376  ;;  %v3408_v28 = vmul.f32 %v4624_v32, %v4624_v32  ;;  %v3409_v18 = vmul.f32 %v4631_v25, %v4631_v25 }
 0x571   :  { %v3379_v41 = vmul.f32 0.001953125, %v3377_v8  ;;  %v3416_v16 = vadd.f32 %v3405_v59, %v3404_v42  ;;  %v3434_v42 = vld [vmem:[%s4757_s6] sm:$0xff] }
 0x572   :  { %v3420_v2 = vsel %vm37_vm10, %v3409_v18, 0.0 }
 0x573   :  { %v3417_v46 = vadd.f32 %v3416_v16, %v3406_v62  ;;  %v3386_v22 = vsub.f32 %v4583_v14, %v3379_v41  ;;  %v3387_v63 = vsub.f32 %v4580_v36, %v3379_v41  ;;  %v3388_v27 = vsub.f32 %v4589_v26, %v3379_v41 }
 0x574   :  { %v3389_v50 = vsub.f32 %v3347_v40, %v3379_v41  ;;  %v3390_v51 = vsub.f32 %v3348_v54, %v3379_v41  ;;  %v3391_v55 = vsub.f32 %v3349_v29, %v3379_v41  ;;  %v3482_v29 = vld [vmem:[%s4756_s7] sm:$0xff] }
 0x575   :  { %v3418_v5 = vadd.f32 %v3417_v46, %v3407_v21  ;;  %v4645_v34 = vmul.f32 %v3386_v22, %v4219_v49  ;;  %v4648_v44 = vmul.f32 %v3387_v63, %v4221_v33  ;;  %v4651_v53 = vmul.f32 %v3388_v27, %v4225_v4  ;;  %v3483_v22 = vld [vmem:[%s4756_s7 + $0x8] sm:$0xff] }
 0x576   :  { %v4654_v36 = vmul.f32 %v3389_v50, %v4227_v61  ;;  %v4662_v17 = vmul.f32 %v3391_v55, %v4231_v3  ;;  %v4665_v40 = vmul.f32 %v3390_v51, %v4229_v1 }
 0x577   :  { %v3419_v14 = vadd.f32 %v3418_v5, %v3408_v28  ;;  %v3410_v26 = vmul.f32 %v4645_v34, %v4645_v34  ;;  %v3411_v24 = vmul.f32 %v4648_v44, %v4648_v44  ;;  %v3412_v54 = vmul.f32 %v4651_v53, %v4651_v53  ;;  %v3435_v28 = vld [vmem:[%s4757_s6 + $0x8] sm:$0xff] }
 0x578   :  { %v3413_v30 = vmul.f32 %v4654_v36, %v4654_v36  ;;  %v3415_v37 = vmul.f32 %v4662_v17, %v4662_v17  ;;  %v3414_v48 = vmul.f32 %v4665_v40, %v4665_v40 }
 0x579   :  { %v3421_v19 = vadd.f32 %v3420_v2, %v3419_v14  ;;  %v3424_v57 = vadd.f32 %v3411_v24, %v3410_v26 }
 0x57a   :  { %v3428_v31 = vsel %vm37_vm10, %v3415_v37, 0.0 }
 0x57b   :  { %3422 = vadd.xlane.f32.xlu2 %v3421_v19  ;;  %v3425_v45 = vadd.f32 %v3424_v57, %v3412_v54 }
 0x57d   :  { %v3426_v35 = vadd.f32 %v3425_v45, %v3413_v30 }
 0x57f   :  { %v3427_v56 = vadd.f32 %v3426_v35, %v3414_v48 }
 0x581   :  { %v3429_v52 = vadd.f32 %v3428_v31, %v3427_v56 }
 0x583   :  { %3430 = vadd.xlane.f32.xlu1 %v3429_v52 }
 0x59c   :  { %3486 = vperm.xlu1 %3883, %v3482_v29  }
 0x5ee   :  { %v3423_v10 = vpop.xlane.xlu2 %3422 }
 0x5ef   :  { %v3432_v58 = vmul.f32 0.001953125, %v3423_v10 }
 0x5f1   :  { %v3436_v0 = vadd.f32 1e-05, %v3432_v58 }
 0x5f3   :  { %3886 = vrsqrt.f32 %v3436_v0  ;;  %vm3444_vm15 = vweird.f32 %v3436_v0 }
 0x5f6   :  { %v3431_v7 = vpop.xlane.xlu1 %3430 }
 0x5f7   :  { %v3433_v20 = vmul.f32 0.001953125, %v3431_v7 }
 0x5f9   :  { %v3887_v12 = vpop.eup %3886  ;;  %v3437_v13 = vadd.f32 1e-05, %v3433_v20 }
 0x5fa   :  { %v3439_v9 = vmul.f32 %v3887_v12, %v3436_v0  ;;  %vm3445_vm14 = vweird.f32 %v3887_v12 }
 0x5fb   :  { %3888 = vrsqrt.f32 %v3437_v13  ;;  %vm3446_vm0 = vmor %vm3444_vm15, %vm3445_vm14  ;;  %vm3454_vm2 = vweird.f32 %v3437_v13 }
 0x5fc   :  { %v3440_v43 = vmul.f32 %v3887_v12, %v3439_v9 }
 0x5fe   :  { %v3441_v11 = vmul.f32 0.5, %v3440_v43 }
 0x600   :  { %v3442_v23 = vsub.f32 1.5, %v3441_v11 }
 0x601   :  { %v3889_v47 = vpop.eup %3888 }
 0x602   :  { %v3449_v39 = vmul.f32 %v3889_v47, %v3437_v13  ;;  %v3443_v59 = vmul.f32 %v3887_v12, %v3442_v23  ;;  %vm3455_vm1 = vweird.f32 %v3889_v47 }
 0x603   :  { %vm3456_vm3 = vmor %vm3454_vm2, %vm3455_vm1 }
 0x604   :  { %v3450_v8 = vmul.f32 %v3889_v47, %v3449_v39  ;;  %v3447_v41 = vsel %vm3446_vm0, %v3887_v12, %v3443_v59 }
 0x605   :  { %v3458_v62 = vmul.f32 %v3447_v41, %v3434_v42 }
 0x606   :  { %v3451_v16 = vmul.f32 0.5, %v3450_v8 }
 0x607   :  { %3462 = vperm.xlu0 %3796, %v3458_v62  }
 0x608   :  { %v3452_v21 = vsub.f32 1.5, %v3451_v16 }
 0x60a   :  { %v3453_v46 = vmul.f32 %v3889_v47, %v3452_v21 }
 0x60c   :  { %v3457_v63 = vsel %vm3456_vm3, %v3889_v47, %v3453_v46 }
 0x60d   :  { %v3459_v27 = vmul.f32 %v3457_v63, %v3435_v28 }
 0x60e   :  { %v3487_v50 = vpop.permute.xlu1 %3486 }
 0x60f   :  { %3491 = vperm.xlu0 %3796, %v3483_v22   ;;  %3467 = vperm.xlu2 %3882, %v3459_v27  }
 0x669   :  { %v3468_v51 = vpop.permute.xlu2 %3467 }
 0x66a   :  { %v3476_v45 = vmul.f32 %v3468_v51, %v4645_v34  ;;  %v3480_v10 = vmul.f32 %v3468_v51, %v4665_v40  ;;  %v3481_v58 = vmul.f32 %v3468_v51, %v4662_v17 }
 0x679   :  { %v3463_v18 = vpop.permute.xlu0 %3462 }
 0x67a   :  { %v3470_v55 = vmul.f32 %v3463_v18, %v4612_v15  ;;  %v3471_v5 = vmul.f32 %v3463_v18, %v4615_v38  ;;  %v3472_v14 = vmul.f32 %v3463_v18, %v4618_v60  ;;  %v3473_v26 = vmul.f32 %v3463_v18, %v4621_v6 }
 0x67b   :  { %v3474_v24 = vmul.f32 %v3463_v18, %v4624_v32  ;;  %v3475_v2 = vmul.f32 %v3463_v18, %v4631_v25  ;;  %v3477_v60 = vmul.f32 %v3468_v51, %v4648_v44  ;;  %v3478_v6 = vmul.f32 %v3468_v51, %v4651_v53 }
 0x67c   :  { %v3494_v19 = vadd.f32 %v3487_v50, %v3470_v55  ;;  %v3495_v54 = vadd.f32 %v3487_v50, %v3471_v5  ;;  %v3496_v57 = vadd.f32 %v3487_v50, %v3472_v14  ;;  %v3497_v30 = vadd.f32 %v3487_v50, %v3473_v26 }
 0x67d   :  { %v3498_v37 = vadd.f32 %v3487_v50, %v3474_v24  ;;  %v3499_v48 = vadd.f32 %v3487_v50, %v3475_v2  ;;  %v3479_v25 = vmul.f32 %v3468_v51, %v4654_v36 }
 0x67e   :  { %v3506_v35 = vmax.f32 %v3494_v19, 0.0  ;;  %v3507_v15 = vmax.f32 %v3495_v54, 0.0  ;;  %v3508_v56 = vmax.f32 %v3496_v57, 0.0  ;;  %v3509_v38 = vmax.f32 %v3497_v30, 0.0 }
 0x67f   :  { %v3510_v31 = vmax.f32 %v3498_v37, 0.0  ;;  %v3511_v32 = vmax.f32 %v3499_v48, 0.0 }
 0x680   :  { %v3518_v52 = vmul.f32 %v3506_v35, %v4219_v49  ;;  %v3519_v29 = vmul.f32 %v3507_v15, %v4221_v33  ;;  %v3520_v34 = vmul.f32 %v3508_v56, %v4225_v4  ;;  %v3521_v0 = vmul.f32 %v3509_v38, %v4227_v61 }
 0x681   :  { %v3522_v44 = vmul.f32 %v3510_v31, %v4229_v1  ;;  %v3492_v7 = vpop.permute.xlu0 %3491  ;;  %v3523_v13 = vmul.f32 %v3511_v32, %v4231_v3 }
 0x682   :  { %3530 = vst [vmem:[%s4758_s8] sm:$0xff] %v3518_v52  ;;  %v3500_v53 = vadd.f32 %v3492_v7, %v3476_v45  ;;  %v3501_v36 = vadd.f32 %v3492_v7, %v3477_v60  ;;  %v3502_v20 = vadd.f32 %v3492_v7, %v3478_v6  ;;  %v3503_v12 = vadd.f32 %v3492_v7, %v3479_v25 }
 0x683   :  { %3531 = vst [vmem:[%s4758_s8 + $0x8] sm:$0xff] %v3519_v29  ;;  %v3504_v17 = vadd.f32 %v3492_v7, %v3480_v10  ;;  %v3505_v40 = vadd.f32 %v3492_v7, %v3481_v58 }
 0x684   :  { %3532 = vst [vmem:[%s4758_s8 + $0x10] sm:$0xff] %v3520_v34  ;;  %v3512_v9 = vmax.f32 %v3500_v53, 0.0  ;;  %v3513_v43 = vmax.f32 %v3501_v36, 0.0  ;;  %v3514_v11 = vmax.f32 %v3502_v20, 0.0  ;;  %v3515_v23 = vmax.f32 %v3503_v12, 0.0 }
 0x685   :  { %3533 = vst [vmem:[%s4758_s8 + $0x18] sm:$0xff] %v3521_v0  ;;  %v3516_v47 = vmax.f32 %v3504_v17, 0.0  ;;  %v3517_v39 = vmax.f32 %v3505_v40, 0.0 }
 0x686   :  { %3534 = vst [vmem:[%s4758_s8 + $0x20] sm:$0xff] %v3522_v44  ;;  %v3524_v42 = vmul.f32 %v3512_v9, %v4219_v49  ;;  %v3525_v59 = vmul.f32 %v3513_v43, %v4221_v33  ;;  %v3526_v8 = vmul.f32 %v3514_v11, %v4225_v4  ;;  %v3527_v41 = vmul.f32 %v3515_v23, %v4227_v61 }
 0x687   :  { %3535 = vst.msk [vmem:[%s4758_s8 + $0x28] sm:$0xff] %vm37_vm10, %v3523_v13  ;;  %v3528_v62 = vmul.f32 %v3516_v47, %v4229_v1  ;;  %v3529_v16 = vmul.f32 %v3517_v39, %v4231_v3 }
 0x688   :  { %3536 = vst [vmem:[%s4758_s8 + $0x30] sm:$0xff] %v3524_v42 }
 0x689   :  { %3537 = vst [vmem:[%s4758_s8 + $0x38] sm:$0xff] %v3525_v59 }
 0x68a   :  { %3538 = vst [vmem:[%s4758_s8 + $0x40] sm:$0xff] %v3526_v8 }
 0x68b   :  { %3539 = vst [vmem:[%s4758_s8 + $0x48] sm:$0xff] %v3527_v41 }
 0x68c   :  { %3540 = vst [vmem:[%s4758_s8 + $0x50] sm:$0xff] %v3528_v62 }
 0x68d   :  { %3541 = vst.msk [vmem:[%s4758_s8 + $0x58] sm:$0xff] %vm37_vm10, %v3529_v16 }

</bundles_post_ra>
